<compile_context>
chip_gen: v5e
topology: v5e:2x2
jax: 0.10.0
libtpu: 0.0.40
codegen_flags: <defaults>
</compile_context>

<pallas_src>
import functools

import jax
import jax.numpy as jnp
from jax.experimental import pallas as pl
from jax.experimental.pallas import tpu as pltpu


def _round_up(v, m):
    return ((v + m - 1) // m) * m


# ----------------------------- Pass 1 kernel ---------------------------------
# grid = (row_tiles, k_tiles); output row-tile written once, on the last k step.
#   acc  = sum_k A[i,k] @ Z[k]            (f32 VMEM accumulator)
#   h    = relu(acc [@ W1] + b1)
#   h    = h * dropout_mask               (training only; mask precomputed)
#   HW_i = h @ W2                         (bf16, lane-dense)
def _gcn_pass1_kernel(*refs, apply_w1, has_mask, z_resident, tk):
    it = iter(refs)
    a_ref = next(it)
    z_ref = next(it)
    w1_ref = next(it) if apply_w1 else None
    b1_ref = next(it)
    w2_ref = next(it)
    mask_ref = next(it) if has_mask else None
    hw_ref = next(it)
    acc_ref = next(it)

    k = pl.program_id(1)

    if z_resident:
        z = z_ref[pl.ds(k * tk, tk), :]     # VMEM-resident Z, sliced per k step
    else:
        z = z_ref[...]

    prod = jnp.dot(a_ref[...], z, preferred_element_type=jnp.float32)

    @pl.when(k == 0)
    def _init():
        acc_ref[...] = prod                 # write directly, no zero-init pass

    @pl.when(k != 0)
    def _accumulate():
        acc_ref[...] += prod

    @pl.when(k == pl.num_programs(1) - 1)
    def _finalize():
        t = acc_ref[...]
        if apply_w1:   # layer-1 weight applied after aggregation (nfeat <= nhid)
            t = jnp.dot(t.astype(jnp.bfloat16), w1_ref[...],
                        preferred_element_type=jnp.float32)
        h = jnp.maximum(t + b1_ref[...], 0.0)
        if has_mask:
            # TODO(synk): dropout mask comes from jax.random, not torch's RNG.
            h = h * mask_ref[...].astype(jnp.float32)
        hw_ref[...] = jnp.dot(h.astype(jnp.bfloat16), w2_ref[...],
                              preferred_element_type=jnp.float32
                              ).astype(hw_ref.dtype)


# ----------------------------- Pass 2 kernel ---------------------------------
#   OUT_i = sum_k A[i,k] @ HW[k] + b2
def _gcn_pass2_kernel(a_ref, hw_ref, b2_ref, out_ref, acc_ref, *,
                      hw_resident, tk):
    k = pl.program_id(1)

    if hw_resident:
        hw = hw_ref[pl.ds(k * tk, tk), :]
    else:
        hw = hw_ref[...]

    prod = jnp.dot(a_ref[...], hw, preferred_element_type=jnp.float32)

    @pl.when(k == 0)
    def _init():
        acc_ref[...] = prod

    @pl.when(k != 0)
    def _accumulate():
        acc_ref[...] += prod

    @pl.when(k == pl.num_programs(1) - 1)
    def _finalize():
        out_ref[...] = (acc_ref[...] + b2_ref[...]).astype(out_ref.dtype)


# ------------------------------- wrapper --------------------------------------
@functools.partial(jax.jit, static_argnames=("dropout", "training"))
def trainnet_forward(x, edge_index, params, dropout_key, *,
                     dropout=0.5, training=False):
    """Fused 2-layer GCN forward.  x: [N, nfeat] f32, edge_index: [2, E] i32."""
    f32, bf16 = jnp.float32, jnp.bfloat16
    n, nfeat = x.shape
    nhid = params["w1"].shape[1]
    nclass = params["w2"].shape[1]

    # Lane-dense (multiple-of-128) feature widths -> unmasked stores, full MXU
    # result width.
    nfeat_p = _round_up(nfeat, 128)
    nhid_p = _round_up(nhid, 128)
    nclass_p = _round_up(nclass, 128)

    # Tiling of the NxN adjacency: fixed tile sizes, pad N up to the tile grid
    # (no divisor hunting -> no pathological small-tk case).  Row grid always
    # has >= 2 tiles so v7x's two TensorCores both get work.
    if n <= 1536:
        n_p = _round_up(max(n, 1), 512)
        tk = n_p                       # single k step
    else:
        n_p = _round_up(n, 2048)
        tk = 2048
    tm = 256 if n_p <= 512 else 512
    nrows, nks = n_p // tm, n_p // tk

    # --- A_hat built, normalized, cast to bf16 and padded in one jitted pass --
    # bf16 halves HBM traffic of the dominant operand; accumulation stays f32.
    a = jnp.zeros((n_p, n_p), f32)
    a = a.at[edge_index[0], edge_index[1]].set(1.0)
    idx = jnp.arange(n)
    a = a.at[idx, idx].set(1.0)        # force self loops (add_remaining_self_loops)
    deg = a.sum(axis=1)
    dis = jnp.where(deg > 0.0, jax.lax.rsqrt(jnp.maximum(deg, 1e-12)), 0.0)
    a_p = (a * dis[:, None] * dis[None, :]).astype(bf16)

    x_p = jnp.zeros((n_p, nfeat_p), bf16).at[:n, :nfeat].set(x.astype(bf16))
    w1_p = jnp.zeros((nfeat_p, nhid_p), bf16).at[:nfeat, :nhid].set(
        params["w1"].astype(bf16))
    w2_p = jnp.zeros((nhid_p, nclass_p), bf16).at[:nhid, :nclass].set(
        params["w2"].astype(bf16))
    b1_p = jnp.zeros((1, nhid_p), f32).at[0, :nhid].set(params["b1"].astype(f32))
    b2_p = jnp.zeros((1, nclass_p), f32).at[0, :nclass].set(params["b2"].astype(f32))

    # Keep the N^2-sized matmul's carried width at min(nfeat_p, nhid_p):
    #   nfeat <= nhid : aggregate X first, apply W1 in the kernel epilogue.
    #   nfeat  > nhid : pre-mix X @ W1 (small matmul, plain XLA) and aggregate
    #                   the narrower result instead (W1 is NOT passed in then).
    apply_w1 = nfeat_p <= nhid_p
    if apply_w1:
        z1, dz = x_p, nfeat_p
    else:
        z1 = jnp.dot(x_p, w1_p, preferred_element_type=f32).astype(bf16)
        dz = nhid_p

    # VMEM residency for the re-used operands (constant block index -> Pallas
    # DMAs them once and never re-reads them from HBM per row tile).
    RESIDENT_LIMIT = 8 * 1024 * 1024
    z_resident = (n_p * dz * 2) <= RESIDENT_LIMIT
    hw_resident = (n_p * nclass_p * 2) <= RESIDENT_LIMIT

    # Dropout keep/scale mask precomputed with jax.random (no on-chip PRNG).
    use_mask = bool(training) and float(dropout) > 0.0
    if use_mask:
        keep = jax.random.bernoulli(dropout_key, 1.0 - dropout, (n_p, nhid_p))
        drop_mask = (keep.astype(f32) * (1.0 / (1.0 - dropout))).astype(bf16)

    cparams = pltpu.CompilerParams(
        dimension_semantics=("parallel", "arbitrary"),
        vmem_limit_bytes=48 * 1024 * 1024,
    )

    # ---- Pass 1: HW = dropout(relu(A @ X [@ W1] + b1)) @ W2  (bf16) ----------
    in_specs = [pl.BlockSpec((tm, tk), lambda i, k: (i, k))]          # A_hat
    inputs = [a_p]
    if z_resident:
        in_specs.append(pl.BlockSpec((n_p, dz), lambda i, k: (0, 0)))  # Z resident
    else:
        in_specs.append(pl.BlockSpec((tk, dz), lambda i, k: (k, 0)))   # Z streamed
    inputs.append(z1)
    if apply_w1:
        in_specs.append(pl.BlockSpec((nfeat_p, nhid_p), lambda i, k: (0, 0)))  # W1
        inputs.append(w1_p)
    in_specs += [pl.BlockSpec((1, nhid_p), lambda i, k: (0, 0)),       # b1
                 pl.BlockSpec((nhid_p, nclass_p), lambda i, k: (0, 0))]  # W2
    inputs += [b1_p, w2_p]
    if use_mask:
        in_specs.append(pl.BlockSpec((tm, nhid_p), lambda i, k: (i, 0)))  # mask
        inputs.append(drop_mask)

    hw = pl.pallas_call(
        functools.partial(_gcn_pass1_kernel, apply_w1=apply_w1,
                          has_mask=use_mask, z_resident=z_resident, tk=tk),
        out_shape=jax.ShapeDtypeStruct((n_p, nclass_p), bf16),
        grid=(nrows, nks),
        in_specs=in_specs,
        out_specs=pl.BlockSpec((tm, nclass_p), lambda i, k: (i, 0)),
        scratch_shapes=[pltpu.VMEM((tm, dz), f32)],
        compiler_params=cparams,
    )(*inputs)

    # ---- Pass 2: OUT = A @ HW + b2 -------------------------------------------
    hw_spec = (pl.BlockSpec((n_p, nclass_p), lambda i, k: (0, 0)) if hw_resident
               else pl.BlockSpec((tk, nclass_p), lambda i, k: (k, 0)))
    out_p = pl.pallas_call(
        functools.partial(_gcn_pass2_kernel, hw_resident=hw_resident, tk=tk),
        out_shape=jax.ShapeDtypeStruct((n_p, nclass_p), f32),
        grid=(nrows, nks),
        in_specs=[pl.BlockSpec((tm, tk), lambda i, k: (i, k)),   # A_hat
                  hw_spec,                                        # HW
                  pl.BlockSpec((1, nclass_p), lambda i, k: (0, 0))],  # b2
        out_specs=pl.BlockSpec((tm, nclass_p), lambda i, k: (i, 0)),
        scratch_shapes=[pltpu.VMEM((tm, nclass_p), f32)],
        compiler_params=cparams,
    )(a_p, hw, b2_p)

    return out_p[:n, :nclass]


# ----------------------------- plain-JAX glue ---------------------------------
def build_norm_adj(edge_index, num_nodes):
    """Unpadded f32 A_hat = D^{-1/2} (A + I) D^{-1/2} (reference check only)."""
    a = jnp.zeros((num_nodes, num_nodes), jnp.float32)
    a = a.at[edge_index[0], edge_index[1]].set(1.0)
    idx = jnp.arange(num_nodes)
    a = a.at[idx, idx].set(1.0)
    deg = a.sum(axis=1)
    d = 1.0 / jnp.sqrt(jnp.maximum(deg, 1e-12))
    return a * d[:, None] * d[None, :]


def init_params(key, nfeat, nhid, nclass):
    """Glorot-uniform weights, small random biases (shapes match GCNConv)."""
    k1, k2, k3, k4 = jax.random.split(key, 4)

    def glorot(k, fan_in, fan_out):
        lim = (6.0 / (fan_in + fan_out)) ** 0.5
        return jax.random.uniform(k, (fan_in, fan_out), jnp.float32, -lim, lim)

    return {
        "w1": glorot(k1, nfeat, nhid),
        "b1": 0.1 * jax.random.normal(k3, (nhid,), jnp.float32),
        "w2": glorot(k2, nhid, nclass),
        "b2": 0.1 * jax.random.normal(k4, (nclass,), jnp.float32),
    }


if __name__ == "__main__":
    # Small, deterministic synthetic problem (shapes implied by the module).
    N, NFEAT, NHID, NCLASS = 16, 8, 32, 4
    DROPOUT = 0.5

    key = jax.random.PRNGKey(0)
    kx, kp, kd = jax.random.split(key, 3)

    x = jax.random.normal(kx, (N, NFEAT), jnp.float32)

    # Bidirectional ring graph: node i <-> node (i+1) mod N.
    src = jnp.arange(N, dtype=jnp.int32)
    dst = (src + 1) % N
    edge_index = jnp.stack([jnp.concatenate([src, dst]),
                            jnp.concatenate([dst, src])], axis=0)  # [2, 2N]

    params = init_params(kp, NFEAT, NHID, NCLASS)

    # Eval-mode forward (dropout = identity), matching model.eval() semantics.
    out_eval = trainnet_forward(x, edge_index, params, kd,
                                dropout=DROPOUT, training=False)
    out_eval = jax.block_until_ready(out_eval)
    assert out_eval.shape == (N, NCLASS) and out_eval.dtype == jnp.float32

    # Pure-JAX f32 reference (eval mode); generous tolerance for bf16 operands.
    adj_norm = build_norm_adj(edge_index, N)
    h_ref = jnp.maximum(adj_norm @ (x @ params["w1"]) + params["b1"][None, :], 0.0)
    ref = adj_norm @ (h_ref @ params["w2"]) + params["b2"][None, :]
    err = float(jnp.max(jnp.abs(out_eval - ref)))
    assert err < 0.1, f"eval-mode mismatch vs reference: max|diff|={err}"

    # Training-mode forward (exercises the precomputed-mask dropout path).
    out_train = trainnet_forward(x, edge_index, params, kd,
                                 dropout=DROPOUT, training=True)
    out_train = jax.block_until_ready(out_train)
    assert out_train.shape == (N, NCLASS)

    print("KERNEL_OK")
</pallas_src>

<mosaic_0001>
module attributes {stable_mosaic.version = 11 : i64} {
  func.func @_gcn_pass1_kernel(%arg0: i32, %arg1: i32, %arg2: memref<256x512xbf16, #tpu.memory_space<vmem>>, %arg3: memref<512x128xbf16, #tpu.memory_space<vmem>>, %arg4: memref<128x128xbf16, #tpu.memory_space<vmem>>, %arg5: memref<1x128xf32, #tpu.memory_space<vmem>>, %arg6: memref<128x128xbf16, #tpu.memory_space<vmem>>, %arg7: memref<256x128xbf16, #tpu.memory_space<vmem>>, %arg8: memref<256x128xf32, #tpu.memory_space<vmem>>) attributes {dimension_semantics = [#tpu.dimension_semantics<parallel>, #tpu.dimension_semantics<arbitrary>], iteration_bounds = array<i64: 2, 1>, scalar_prefetch = 0 : i64, scratch_operands = 1 : i64, tpu.core_type = #tpu.core_type<tc>, window_params = [{transform_indices = @transform_0, window_bounds = array<i64: 256, 512>}, {pipeline_mode = #tpu.pipeline_mode<synchronous>, transform_indices = @transform_1, window_bounds = array<i64: 512, 128>}, {pipeline_mode = #tpu.pipeline_mode<synchronous>, transform_indices = @transform_2, window_bounds = array<i64: 128, 128>}, {pipeline_mode = #tpu.pipeline_mode<synchronous>, transform_indices = @transform_3, window_bounds = array<i64: 1, 128>}, {pipeline_mode = #tpu.pipeline_mode<synchronous>, transform_indices = @transform_4, window_bounds = array<i64: 128, 128>}, {transform_indices = @transform_5, window_bounds = array<i64: 256, 128>}]} {
    %c512_i32 = arith.constant 512 : i32
    %0 = arith.muli %arg1, %c512_i32 : i32
    %1 = arith.index_cast %0 : i32 to index
    %c0 = arith.constant 0 : index
    %2 = vector.load %arg3[%1, %c0] : memref<512x128xbf16, #tpu.memory_space<vmem>>, vector<512x128xbf16>
    %c0_0 = arith.constant 0 : index
    %c0_1 = arith.constant 0 : index
    %3 = vector.load %arg2[%c0_0, %c0_1] : memref<256x512xbf16, #tpu.memory_space<vmem>>, vector<256x512xbf16>
    %cst = arith.constant dense<0.000000e+00> : vector<256x128xf32>
    %4 = tpu.matmul %3, %2, %cst {dimension_numbers = #tpu.dot_dimension_numbers<[1], [0], [0], [1], [0, 0, 1, 1], [], []>} : vector<256x512xbf16>, vector<512x128xbf16>, vector<256x128xf32> -> vector<256x128xf32>
    %c0_i32 = arith.constant 0 : i32
    %5 = arith.cmpi eq, %arg1, %c0_i32 : i32
    %6 = arith.extui %5 : i1 to i32
    %c0_i32_2 = arith.constant 0 : i32
    %7 = arith.cmpi ne, %6, %c0_i32_2 : i32
    scf.if %7 {
      %c0_7 = arith.constant 0 : index
      %c0_8 = arith.constant 0 : index
      %14 = vector.load %arg8[%c0_7, %c0_8] : memref<256x128xf32, #tpu.memory_space<vmem>>, vector<256x128xf32>
      tpu.vector_store %arg8[%c0_7, %c0_8], %4 {strides = array<i32>} : memref<256x128xf32, #tpu.memory_space<vmem>>, vector<256x128xf32>,
    } else {
    }
    %c0_i32_3 = arith.constant 0 : i32
    %8 = arith.cmpi ne, %arg1, %c0_i32_3 : i32
    %9 = arith.extui %8 : i1 to i32
    %c0_i32_4 = arith.constant 0 : i32
    %10 = arith.cmpi ne, %9, %c0_i32_4 : i32
    scf.if %10 {
      %c0_7 = arith.constant 0 : index
      %c0_8 = arith.constant 0 : index
      %14 = vector.load %arg8[%c0_7, %c0_8] : memref<256x128xf32, #tpu.memory_space<vmem>>, vector<256x128xf32>
      %15 = arith.addf %14, %4 : vector<256x128xf32>
      %c0_9 = arith.constant 0 : index
      %c0_10 = arith.constant 0 : index
      %16 = vector.load %arg8[%c0_9, %c0_10] : memref<256x128xf32, #tpu.memory_space<vmem>>, vector<256x128xf32>
      tpu.vector_store %arg8[%c0_9, %c0_10], %15 {strides = array<i32>} : memref<256x128xf32, #tpu.memory_space<vmem>>, vector<256x128xf32>,
    } else {
    }
    %c0_i32_5 = arith.constant 0 : i32
    %11 = arith.cmpi eq, %arg1, %c0_i32_5 : i32
    %12 = arith.extui %11 : i1 to i32
    %c0_i32_6 = arith.constant 0 : i32
    %13 = arith.cmpi ne, %12, %c0_i32_6 : i32
    scf.if %13 {
      %c0_7 = arith.constant 0 : index
      %c0_8 = arith.constant 0 : index
      %14 = vector.load %arg8[%c0_7, %c0_8] : memref<256x128xf32, #tpu.memory_space<vmem>>, vector<256x128xf32>
      %15 = arith.truncf %14 : vector<256x128xf32> to vector<256x128xbf16>
      %c0_9 = arith.constant 0 : index
      %c0_10 = arith.constant 0 : index
      %16 = vector.load %arg4[%c0_9, %c0_10] : memref<128x128xbf16, #tpu.memory_space<vmem>>, vector<128x128xbf16>
      %cst_11 = arith.constant dense<0.000000e+00> : vector<256x128xf32>
      %17 = tpu.matmul %15, %16, %cst_11 {dimension_numbers = #tpu.dot_dimension_numbers<[1], [0], [0], [1], [0, 0, 1, 1], [], []>} : vector<256x128xbf16>, vector<128x128xbf16>, vector<256x128xf32> -> vector<256x128xf32>
      %c0_12 = arith.constant 0 : index
      %c0_13 = arith.constant 0 : index
      %18 = vector.load %arg5[%c0_12, %c0_13] : memref<1x128xf32, #tpu.memory_space<vmem>>, vector<1x128xf32>
      %19 = vector.broadcast %18 : vector<1x128xf32> to vector<256x128xf32>
      %20 = arith.addf %17, %19 : vector<256x128xf32>
      %cst_14 = arith.constant 0.000000e+00 : f32
      %21 = vector.broadcast %cst_14 : f32 to vector<256x128xf32>
      %22 = arith.maximumf %20, %21 : vector<256x128xf32>
      %23 = arith.truncf %22 : vector<256x128xf32> to vector<256x128xbf16>
      %c0_15 = arith.constant 0 : index
      %c0_16 = arith.constant 0 : index
      %24 = vector.load %arg6[%c0_15, %c0_16] : memref<128x128xbf16, #tpu.memory_space<vmem>>, vector<128x128xbf16>
      %cst_17 = arith.constant dense<0.000000e+00> : vector<256x128xf32>
      %25 = tpu.matmul %23, %24, %cst_17 {dimension_numbers = #tpu.dot_dimension_numbers<[1], [0], [0], [1], [0, 0, 1, 1], [], []>} : vector<256x128xbf16>, vector<128x128xbf16>, vector<256x128xf32> -> vector<256x128xf32>
      %26 = arith.truncf %25 : vector<256x128xf32> to vector<256x128xbf16>
      %c0_18 = arith.constant 0 : index
      %c0_19 = arith.constant 0 : index
      %27 = vector.load %arg7[%c0_18, %c0_19] : memref<256x128xbf16, #tpu.memory_space<vmem>>, vector<256x128xbf16>
      tpu.vector_store %arg7[%c0_18, %c0_19], %26 {strides = array<i32>} : memref<256x128xbf16, #tpu.memory_space<vmem>>, vector<256x128xbf16>,
    } else {
    }
    return
  }
  func.func @transform_0(%arg0: i32, %arg1: i32) -> (i32, i32) {
    %c0_i32 = arith.constant 0 : i32
    return %arg0, %arg1 : i32, i32
  }
  func.func @transform_1(%arg0: i32, %arg1: i32) -> (i32, i32) {
    %c0_i32 = arith.constant 0 : i32
    %c0_i32_0 = arith.constant 0 : i32
    %c0_i32_1 = arith.constant 0 : i32
    return %c0_i32, %c0_i32_0 : i32, i32
  }
  func.func @transform_2(%arg0: i32, %arg1: i32) -> (i32, i32) {
    %c0_i32 = arith.constant 0 : i32
    %c0_i32_0 = arith.constant 0 : i32
    %c0_i32_1 = arith.constant 0 : i32
    return %c0_i32, %c0_i32_0 : i32, i32
  }
  func.func @transform_3(%arg0: i32, %arg1: i32) -> (i32, i32) {
    %c0_i32 = arith.constant 0 : i32
    %c0_i32_0 = arith.constant 0 : i32
    %c0_i32_1 = arith.constant 0 : i32
    return %c0_i32, %c0_i32_0 : i32, i32
  }
  func.func @transform_4(%arg0: i32, %arg1: i32) -> (i32, i32) {
    %c0_i32 = arith.constant 0 : i32
    %c0_i32_0 = arith.constant 0 : i32
    %c0_i32_1 = arith.constant 0 : i32
    return %c0_i32, %c0_i32_0 : i32, i32
  }
  func.func @transform_5(%arg0: i32, %arg1: i32) -> (i32, i32) {
    %c0_i32 = arith.constant 0 : i32
    %c0_i32_0 = arith.constant 0 : i32
    return %arg0, %c0_i32 : i32, i32
  }
}

module attributes {stable_mosaic.version = 11 : i64} {
  func.func @_gcn_pass2_kernel(%arg0: i32, %arg1: i32, %arg2: memref<256x512xbf16, #tpu.memory_space<vmem>>, %arg3: memref<512x128xbf16, #tpu.memory_space<vmem>>, %arg4: memref<1x128xf32, #tpu.memory_space<vmem>>, %arg5: memref<256x128xf32, #tpu.memory_space<vmem>>, %arg6: memref<256x128xf32, #tpu.memory_space<vmem>>) attributes {dimension_semantics = [#tpu.dimension_semantics<parallel>, #tpu.dimension_semantics<arbitrary>], iteration_bounds = array<i64: 2, 1>, scalar_prefetch = 0 : i64, scratch_operands = 1 : i64, tpu.core_type = #tpu.core_type<tc>, window_params = [{transform_indices = @transform_0, window_bounds = array<i64: 256, 512>}, {pipeline_mode = #tpu.pipeline_mode<synchronous>, transform_indices = @transform_1, window_bounds = array<i64: 512, 128>}, {pipeline_mode = #tpu.pipeline_mode<synchronous>, transform_indices = @transform_2, window_bounds = array<i64: 1, 128>}, {transform_indices = @transform_3, window_bounds = array<i64: 256, 128>}]} {
    %c512_i32 = arith.constant 512 : i32
    %0 = arith.muli %arg1, %c512_i32 : i32
    %1 = arith.index_cast %0 : i32 to index
    %c0 = arith.constant 0 : index
    %2 = vector.load %arg3[%1, %c0] : memref<512x128xbf16, #tpu.memory_space<vmem>>, vector<512x128xbf16>
    %c0_0 = arith.constant 0 : index
    %c0_1 = arith.constant 0 : index
    %3 = vector.load %arg2[%c0_0, %c0_1] : memref<256x512xbf16, #tpu.memory_space<vmem>>, vector<256x512xbf16>
    %cst = arith.constant dense<0.000000e+00> : vector<256x128xf32>
    %4 = tpu.matmul %3, %2, %cst {dimension_numbers = #tpu.dot_dimension_numbers<[1], [0], [0], [1], [0, 0, 1, 1], [], []>} : vector<256x512xbf16>, vector<512x128xbf16>, vector<256x128xf32> -> vector<256x128xf32>
    %c0_i32 = arith.constant 0 : i32
    %5 = arith.cmpi eq, %arg1, %c0_i32 : i32
    %6 = arith.extui %5 : i1 to i32
    %c0_i32_2 = arith.constant 0 : i32
    %7 = arith.cmpi ne, %6, %c0_i32_2 : i32
    scf.if %7 {
      %c0_7 = arith.constant 0 : index
      %c0_8 = arith.constant 0 : index
      %14 = vector.load %arg6[%c0_7, %c0_8] : memref<256x128xf32, #tpu.memory_space<vmem>>, vector<256x128xf32>
      tpu.vector_store %arg6[%c0_7, %c0_8], %4 {strides = array<i32>} : memref<256x128xf32, #tpu.memory_space<vmem>>, vector<256x128xf32>,
    } else {
    }
    %c0_i32_3 = arith.constant 0 : i32
    %8 = arith.cmpi ne, %arg1, %c0_i32_3 : i32
    %9 = arith.extui %8 : i1 to i32
    %c0_i32_4 = arith.constant 0 : i32
    %10 = arith.cmpi ne, %9, %c0_i32_4 : i32
    scf.if %10 {
      %c0_7 = arith.constant 0 : index
      %c0_8 = arith.constant 0 : index
      %14 = vector.load %arg6[%c0_7, %c0_8] : memref<256x128xf32, #tpu.memory_space<vmem>>, vector<256x128xf32>
      %15 = arith.addf %14, %4 : vector<256x128xf32>
      %c0_9 = arith.constant 0 : index
      %c0_10 = arith.constant 0 : index
      %16 = vector.load %arg6[%c0_9, %c0_10] : memref<256x128xf32, #tpu.memory_space<vmem>>, vector<256x128xf32>
      tpu.vector_store %arg6[%c0_9, %c0_10], %15 {strides = array<i32>} : memref<256x128xf32, #tpu.memory_space<vmem>>, vector<256x128xf32>,
    } else {
    }
    %c0_i32_5 = arith.constant 0 : i32
    %11 = arith.cmpi eq, %arg1, %c0_i32_5 : i32
    %12 = arith.extui %11 : i1 to i32
    %c0_i32_6 = arith.constant 0 : i32
    %13 = arith.cmpi ne, %12, %c0_i32_6 : i32
    scf.if %13 {
      %c0_7 = arith.constant 0 : index
      %c0_8 = arith.constant 0 : index
      %14 = vector.load %arg6[%c0_7, %c0_8] : memref<256x128xf32, #tpu.memory_space<vmem>>, vector<256x128xf32>
      %c0_9 = arith.constant 0 : index
      %c0_10 = arith.constant 0 : index
      %15 = vector.load %arg4[%c0_9, %c0_10] : memref<1x128xf32, #tpu.memory_space<vmem>>, vector<1x128xf32>
      %16 = vector.broadcast %15 : vector<1x128xf32> to vector<256x128xf32>
      %17 = arith.addf %14, %16 : vector<256x128xf32>
      %c0_11 = arith.constant 0 : index
      %c0_12 = arith.constant 0 : index
      %18 = vector.load %arg5[%c0_11, %c0_12] : memref<256x128xf32, #tpu.memory_space<vmem>>, vector<256x128xf32>
      tpu.vector_store %arg5[%c0_11, %c0_12], %17 {strides = array<i32>} : memref<256x128xf32, #tpu.memory_space<vmem>>, vector<256x128xf32>,
    } else {
    }
    return
  }
  func.func @transform_0(%arg0: i32, %arg1: i32) -> (i32, i32) {
    %c0_i32 = arith.constant 0 : i32
    return %arg0, %arg1 : i32, i32
  }
  func.func @transform_1(%arg0: i32, %arg1: i32) -> (i32, i32) {
    %c0_i32 = arith.constant 0 : i32
    %c0_i32_0 = arith.constant 0 : i32
    %c0_i32_1 = arith.constant 0 : i32
    return %c0_i32, %c0_i32_0 : i32, i32
  }
  func.func @transform_2(%arg0: i32, %arg1: i32) -> (i32, i32) {
    %c0_i32 = arith.constant 0 : i32
    %c0_i32_0 = arith.constant 0 : i32
    %c0_i32_1 = arith.constant 0 : i32
    return %c0_i32, %c0_i32_0 : i32, i32
  }
  func.func @transform_3(%arg0: i32, %arg1: i32) -> (i32, i32) {
    %c0_i32 = arith.constant 0 : i32
    %c0_i32_0 = arith.constant 0 : i32
    return %arg0, %c0_i32 : i32, i32
  }
}

</mosaic_0001>

<bundles_post_ra>
// kernel: trainnet_forward.3
= control target key start
LH: loop header
LB: loop body
LE: loop exit
PB: predicated region body
PF: predicated region fallthrough
CT: control target
= control target key end

     0   :  { %s2080_s12 = smov 0   ;;  %s2082_s13 = smov 0   ;;  %s2417_s0 = inlined_call_operand.vmem [shape: bf16[512,512], index: 0, kind: input, shape index: {}]   ;;  %s2418_s1 = inlined_call_operand.vmem [shape: bf16[512,128], index: 1, kind: input, shape index: {}]   ;;  %s2419_s2 = inlined_call_operand.vmem [shape: f32[1,128], index: 2, kind: input, shape index: {}]   ;;  %s2420_s3 = inlined_call_operand.vmem [shape: f32[512,128], index: 3, kind: output, shape index: {}]  }
   0x1   :  { %s2084_s14 = smov 0  }
   0x2 LB: > { %s25_s15 = sadd.s32 1, %s2054_s13  ;;  %p1522_p0 = scmp.ge.s32.totalorder %s2058_s14, 1  ;;  %s2058_s14 = sphi %s2084_s14, %s13_s14   ;;  %s2054_s13 = sphi %s2082_s13, %s2422_s13   ;;  %s2050_s12 = sphi %s2080_s12, %s2421_s12  }
   0x3   : > { %p27_p1 = scmp.ge.s32.totalorder %s25_s15, 2  ;;  %p158_p2 = scmp.lt.s32.totalorder %s2058_s14, 3 }
   0x5   : > { %s2424_s15 = smov (%p27_p1, %s25_s15), 0  ;;  %p159_p3 = pnand %p1522_p0, %p158_p2 }
   0x6   : > { %s1523_s17 = sshll.u32 (!%p159_p3), %s2050_s12, 5 }
   0x7   : > { %162 = sbr.rel (%p159_p3) target bundleno = 433 (0x1b1), region = 32  ;;  %p189_p4 = scmp.lt.s32.totalorder (!%p159_p3), %s1523_s17, 63 }
   0xc   : > { %v1922_v0 = vld [vmem:[%s2418_s1 + $0x38] sm:$0xff]  ;;  %v1921_v4 = vld [vmem:[%s2418_s1 + $0x30] sm:$0xff]  ;;  %v1920_v8 = vld [vmem:[%s2418_s1 + $0x28] sm:$0xff]  ;;  %s2426_s17 = smov (!%p189_p4, %s1523_s17), 63 }
   0xd   : > { %v1930_v1 = vld [vmem:[%s2418_s1 + $0x78] sm:$0xff]  ;;  %850 = vmatpush.bf16.msra.mxu0 %v1922_v0  ;;  %v1929_v5 = vld [vmem:[%s2418_s1 + $0x70] sm:$0xff]  ;;  %v1928_v9 = vld [vmem:[%s2418_s1 + $0x68] sm:$0xff]  ;;  %s1914_s19 = sshll.u32 %s2426_s17, 4  ;;  %s1527_s11 = sshll.u32 %s2426_s17, 3 }
   0xe   : > { %v1938_v2 = vld [vmem:[%s2418_s1 + $0xb8] sm:$0xff]  ;;  %939 = vmatpush.bf16.msra.mxu1 %v1930_v1  ;;  %v1937_v6 = vld [vmem:[%s2418_s1 + $0xb0] sm:$0xff]  ;;  %v1936_v10 = vld [vmem:[%s2418_s1 + $0xa8] sm:$0xff]  ;;  %s2185_s12 = scalar_lea.vmem %s2417_s0, %s1914_s19  ;;  %s2286_s21 = scalar_lea.vmem %s2420_s3, %s1527_s11 }
   0xf   : > { %v1946_v3 = vld [vmem:[%s2418_s1 + $0xf8] sm:$0xff]  ;;  %1028 = vmatpush.bf16.msra.mxu2 %v1938_v2  ;;  %v1945_v7 = vld [vmem:[%s2418_s1 + $0xf0] sm:$0xff]  ;;  %v1944_v11 = vld [vmem:[%s2418_s1 + $0xe8] sm:$0xff] }
  0x10   : > { %1117 = vmatpush.bf16.msra.mxu3 %v1946_v3  ;;  %v1919_v12 = vld [vmem:[%s2418_s1 + $0x20] sm:$0xff]  ;;  %v1918_v16 = vld [vmem:[%s2418_s1 + $0x18] sm:$0xff]  ;;  %v1917_v20 = vld [vmem:[%s2418_s1 + $0x10] sm:$0xff] }
  0x11   : > { %851 = vmatpush.bf16.msra.mxu0 %v1921_v4  ;;  %v1927_v13 = vld [vmem:[%s2418_s1 + $0x60] sm:$0xff]  ;;  %v1926_v17 = vld [vmem:[%s2418_s1 + $0x58] sm:$0xff]  ;;  %v1925_v21 = vld [vmem:[%s2418_s1 + $0x50] sm:$0xff] }
  0x12   : > { %940 = vmatpush.bf16.msra.mxu1 %v1929_v5  ;;  %v1935_v14 = vld [vmem:[%s2418_s1 + $0xa0] sm:$0xff]  ;;  %v1934_v18 = vld [vmem:[%s2418_s1 + $0x98] sm:$0xff]  ;;  %v1933_v22 = vld [vmem:[%s2418_s1 + $0x90] sm:$0xff] }
  0x13   : > { %1029 = vmatpush.bf16.msra.mxu2 %v1937_v6  ;;  %v1943_v15 = vld [vmem:[%s2418_s1 + $0xe0] sm:$0xff]  ;;  %v1942_v19 = vld [vmem:[%s2418_s1 + $0xd8] sm:$0xff]  ;;  %v1941_v23 = vld [vmem:[%s2418_s1 + $0xd0] sm:$0xff] }
  0x14   : > { %1118 = vmatpush.bf16.msra.mxu3 %v1945_v7  ;;  %v1916_v24 = vld [vmem:[%s2418_s1 + $0x8] sm:$0xff]  ;;  %v1915_v28 = vld [vmem:[%s2418_s1] sm:$0xff]  ;;  %v1949_v33 = vld [vmem:[%s2185_s12 + $0xc] sm:$0xf0] }
  0x15   : > { %852 = vmatpush.bf16.msra.mxu0 %v1920_v8  ;;  %v1924_v25 = vld [vmem:[%s2418_s1 + $0x48] sm:$0xff]  ;;  %v1923_v29 = vld [vmem:[%s2418_s1 + $0x40] sm:$0xff]  ;;  %v1532_v35 = vld [vmem:[%s2185_s12 + $0x10] sm:$0xf0] }
  0x16   : > { %941 = vmatpush.bf16.msra.mxu1 %v1928_v9  ;;  %v1932_v26 = vld [vmem:[%s2418_s1 + $0x88] sm:$0xff]  ;;  %v1931_v30 = vld [vmem:[%s2418_s1 + $0x80] sm:$0xff]  ;;  %v1950_v37 = vld [vmem:[%s2185_s12 + $0x14] sm:$0xf0] }
  0x17   : > { %1030 = vmatpush.bf16.msra.mxu2 %v1936_v10  ;;  %v1940_v27 = vld [vmem:[%s2418_s1 + $0xc8] sm:$0xff]  ;;  %v1939_v31 = vld [vmem:[%s2418_s1 + $0xc0] sm:$0xff]  ;;  %v1540_v39 = vld [vmem:[%s2185_s12 + $0x18] sm:$0xf0] }
  0x18   : > { %1119 = vmatpush.bf16.msra.mxu3 %v1944_v11  ;;  %v1530_v32 = vld [vmem:[%s2185_s12] sm:$0xf]  ;;  %v1947_v34 = vld [vmem:[%s2185_s12 + $0x4] sm:$0xf]  ;;  %v1538_v36 = vld [vmem:[%s2185_s12 + $0x8] sm:$0xf] }
  0x19   : > { %853 = vmatpush.bf16.msra.mxu0 %v1919_v12  ;;  %v1948_v38 = vld [vmem:[%s2185_s12 + $0xc] sm:$0xf]  ;;  %v1531_v40 = vor.u32 %v1949_v33, %v1530_v32  ;;  %v1535_v41 = vor.u32 %v1947_v34, %v1532_v35  ;;  %v1539_v42 = vor.u32 %v1950_v37, %v1538_v36  ;;  %v1546_v44 = vld [vmem:[%s2185_s12 + $0x20] sm:$0xf]  ;;  %v1953_v45 = vld [vmem:[%s2185_s12 + $0x2c] sm:$0xf0] }
  0x1a   : > { %942 = vmatpush.bf16.msra.mxu1 %v1927_v13  ;;  %v1543_v43 = vor.u32 %v1948_v38, %v1540_v39  ;;  %v1951_v46 = vld [vmem:[%s2185_s12 + $0x24] sm:$0xf]  ;;  %v1548_v47 = vld [vmem:[%s2185_s12 + $0x30] sm:$0xf0]  ;;  %v1554_v48 = vld [vmem:[%s2185_s12 + $0x28] sm:$0xf]  ;;  %v1547_v52 = vor.u32 %v1953_v45, %v1546_v44 }
  0x1b   : > { %1031 = vmatpush.bf16.msra.mxu2 %v1935_v14  ;;  %v1954_v49 = vld [vmem:[%s2185_s12 + $0x34] sm:$0xf0]  ;;  %v1952_v50 = vld [vmem:[%s2185_s12 + $0x2c] sm:$0xf]  ;;  %v1556_v51 = vld [vmem:[%s2185_s12 + $0x38] sm:$0xf0]  ;;  %v1551_v53 = vor.u32 %v1951_v46, %v1548_v47 }
  0x1c   : > { %1120 = vmatpush.bf16.msra.mxu3 %v1943_v15  ;;  %v1555_v54 = vor.u32 %v1954_v49, %v1554_v48  ;;  %v1559_v55 = vor.u32 %v1952_v50, %v1556_v51  ;;  %v1562_v56 = vld [vmem:[%s2185_s12 + $0x40] sm:$0xf]  ;;  %v1957_v57 = vld [vmem:[%s2185_s12 + $0x4c] sm:$0xf0]  ;;  %v1955_v58 = vld [vmem:[%s2185_s12 + $0x44] sm:$0xf] }
  0x1d   : > { %854 = vmatpush.bf16.msra.mxu0 %v1918_v16  ;;  %v1564_v59 = vld [vmem:[%s2185_s12 + $0x50] sm:$0xf0]  ;;  %v1570_v60 = vld [vmem:[%s2185_s12 + $0x48] sm:$0xf]  ;;  %v1958_v61 = vld [vmem:[%s2185_s12 + $0x54] sm:$0xf0]  ;;  %v1563_v0 = vor.u32 %v1957_v57, %v1562_v56 }
  0x1e   : > { %943 = vmatpush.bf16.msra.mxu1 %v1926_v17  ;;  %v1956_v62 = vld [vmem:[%s2185_s12 + $0x4c] sm:$0xf]  ;;  %v1572_v63 = vld [vmem:[%s2185_s12 + $0x58] sm:$0xf0]  ;;  %v1567_v1 = vor.u32 %v1955_v58, %v1564_v59  ;;  %v1571_v2 = vor.u32 %v1958_v61, %v1570_v60  ;;  %v1578_v4 = vld [vmem:[%s2185_s12 + $0x60] sm:$0xf] }
  0x1f   : > { %1032 = vmatpush.bf16.msra.mxu2 %v1934_v18  ;;  %v1575_v3 = vor.u32 %v1956_v62, %v1572_v63  ;;  %v1961_v5 = vld [vmem:[%s2185_s12 + $0x6c] sm:$0xf0]  ;;  %v1959_v6 = vld [vmem:[%s2185_s12 + $0x64] sm:$0xf]  ;;  %v1580_v7 = vld [vmem:[%s2185_s12 + $0x70] sm:$0xf0] }
  0x20   : > { %1121 = vmatpush.bf16.msra.mxu3 %v1942_v19  ;;  %v1586_v8 = vld [vmem:[%s2185_s12 + $0x68] sm:$0xf]  ;;  %v1962_v9 = vld [vmem:[%s2185_s12 + $0x74] sm:$0xf0]  ;;  %v1960_v10 = vld [vmem:[%s2185_s12 + $0x6c] sm:$0xf]  ;;  %v1579_v12 = vor.u32 %v1961_v5, %v1578_v4  ;;  %v1583_v13 = vor.u32 %v1959_v6, %v1580_v7 }
  0x21   : > { %855 = vmatpush.bf16.msra.mxu0 %v1917_v20  ;;  %v1588_v11 = vld [vmem:[%s2185_s12 + $0x78] sm:$0xf0]  ;;  %v1587_v14 = vor.u32 %v1962_v9, %v1586_v8  ;;  %v1594_v16 = vld [vmem:[%s2185_s12 + $0x80] sm:$0xf]  ;;  %v1965_v17 = vld [vmem:[%s2185_s12 + $0x8c] sm:$0xf0] }
  0x22   : > { %944 = vmatpush.bf16.msra.mxu1 %v1925_v21  ;;  %v1591_v15 = vor.u32 %v1960_v10, %v1588_v11  ;;  %v1963_v18 = vld [vmem:[%s2185_s12 + $0x84] sm:$0xf]  ;;  %v1596_v19 = vld [vmem:[%s2185_s12 + $0x90] sm:$0xf0]  ;;  %v1602_v20 = vld [vmem:[%s2185_s12 + $0x88] sm:$0xf] }
  0x23   : > { %1033 = vmatpush.bf16.msra.mxu2 %v1933_v22  ;;  %v1966_v21 = vld [vmem:[%s2185_s12 + $0x94] sm:$0xf0]  ;;  %v1964_v22 = vld [vmem:[%s2185_s12 + $0x8c] sm:$0xf]  ;;  %v1618_v32 = vld [vmem:[%s2185_s12 + $0xa8] sm:$0xf] }
  0x24   : > { %1122 = vmatpush.bf16.msra.mxu3 %v1941_v23  ;;  %v1604_v23 = vld [vmem:[%s2185_s12 + $0x98] sm:$0xf0]  ;;  %v1970_v33 = vld [vmem:[%s2185_s12 + $0xb4] sm:$0xf0]  ;;  %v1968_v34 = vld [vmem:[%s2185_s12 + $0xac] sm:$0xf] }
  0x25   : > { %856 = vmatpush.bf16.msra.mxu0 %v1916_v24  ;;  %v1595_v24 = vor.u32 %v1965_v17, %v1594_v16  ;;  %v1620_v35 = vld [vmem:[%s2185_s12 + $0xb8] sm:$0xf0]  ;;  %v1619_v38 = vor.u32 %v1970_v33, %v1618_v32  ;;  %v1634_v44 = vld [vmem:[%s2185_s12 + $0xc8] sm:$0xf]  ;;  %v1974_v45 = vld [vmem:[%s2185_s12 + $0xd4] sm:$0xf0] }
  0x26   : > { %945 = vmatpush.bf16.msra.mxu1 %v1924_v25  ;;  %v1599_v25 = vor.u32 %v1963_v18, %v1596_v19  ;;  %v1623_v39 = vor.u32 %v1968_v34, %v1620_v35  ;;  %v1972_v46 = vld [vmem:[%s2185_s12 + $0xcc] sm:$0xf]  ;;  %v1636_v47 = vld [vmem:[%s2185_s12 + $0xd8] sm:$0xf0]  ;;  %v1635_v50 = vor.u32 %v1974_v45, %v1634_v44  ;;  %v1650_v56 = vld [vmem:[%s2185_s12 + $0xe8] sm:$0xf] }
  0x27   : > { %1034 = vmatpush.bf16.msra.mxu2 %v1932_v26  ;;  %v1603_v26 = vor.u32 %v1966_v21, %v1602_v20  ;;  %v1639_v51 = vor.u32 %v1972_v46, %v1636_v47  ;;  %v1978_v57 = vld [vmem:[%s2185_s12 + $0xf4] sm:$0xf0]  ;;  %v1976_v58 = vld [vmem:[%s2185_s12 + $0xec] sm:$0xf]  ;;  %v1652_v59 = vld [vmem:[%s2185_s12 + $0xf8] sm:$0xf0] }
  0x28   : > { %1123 = vmatpush.bf16.msra.mxu3 %v1940_v27  ;;  %v1607_v27 = vor.u32 %v1964_v22, %v1604_v23  ;;  %v1651_v62 = vor.u32 %v1978_v57, %v1650_v56  ;;  %v1655_v63 = vor.u32 %v1976_v58, %v1652_v59  ;;  %v1666_v4 = vld [vmem:[%s2185_s12 + $0x108] sm:$0xf]  ;;  %v1982_v5 = vld [vmem:[%s2185_s12 + $0x114] sm:$0xf0]  ;;  %v1980_v6 = vld [vmem:[%s2185_s12 + $0x10c] sm:$0xf] }
  0x29   : > { %857 = vmatpush.bf16.msra.mxu0 %v1915_v28  ;;  %v1610_v28 = vld [vmem:[%s2185_s12 + $0xa0] sm:$0xf]  ;;  %v1668_v7 = vld [vmem:[%s2185_s12 + $0x118] sm:$0xf0]  ;;  %v1985_v23 = vld [vmem:[%s2185_s12 + $0x12c] sm:$0xf0] }
  0x2a   : > { %946 = vmatpush.bf16.msra.mxu1 %v1923_v29  ;;  %v1969_v29 = vld [vmem:[%s2185_s12 + $0xac] sm:$0xf0]  ;;  %v2281_v18 = vld [vmem:[%s2419_s2] ss:$0 sm:$0xff]  ;;  %v1990_v56 = vld [vmem:[%s2185_s12 + $0x154] sm:$0xf0] }
  0x2b   : > { %1035 = vmatpush.bf16.msra.mxu2 %v1931_v30  ;;  %v1967_v30 = vld [vmem:[%s2185_s12 + $0xa4] sm:$0xf]  ;;  %v1611_v36 = vor.u32 %v1969_v29, %v1610_v28  ;;  %v1674_v22 = vld [vmem:[%s2185_s12 + $0x120] sm:$0xf]  ;;  %v1986_v28 = vld [vmem:[%s2185_s12 + $0x134] sm:$0xf0] }
  0x2c   : > { %1124 = vmatpush.bf16.msra.mxu3 %v1939_v31  ;;  %858 = vmatmul.bf16.vlgmr.msra.gmra.mxu0 %v1531_v40  ;;  %v1612_v31 = vld [vmem:[%s2185_s12 + $0xb0] sm:$0xf0]  ;;  %v1626_v40 = vld [vmem:[%s2185_s12 + $0xc0] sm:$0xf]  ;;  %v1984_v29 = vld [vmem:[%s2185_s12 + $0x12c] sm:$0xf]  ;;  %v1675_v34 = vor.u32 %v1985_v23, %v1674_v22 }
  0x2d   : > { %947 = vmatmul.bf16.vlgmr.msra.gmra.mxu1 %v1535_v41  ;;  %v1615_v37 = vor.u32 %v1967_v30, %v1612_v31  ;;  %v1973_v41 = vld [vmem:[%s2185_s12 + $0xcc] sm:$0xf0]  ;;  %v1684_v30 = vld [vmem:[%s2185_s12 + $0x138] sm:$0xf0]  ;;  %v1988_v57 = vld [vmem:[%s2185_s12 + $0x14c] sm:$0xf] }
  0x2e   : > { %1036 = vmatmul.bf16.vlgmr.msra.gmra.mxu2 %v1539_v42  ;;  %v1971_v42 = vld [vmem:[%s2185_s12 + $0xc4] sm:$0xf]  ;;  %v1627_v48 = vor.u32 %v1973_v41, %v1626_v40  ;;  %v1687_v40 = vor.u32 %v1984_v29, %v1684_v30  ;;  %v1700_v58 = vld [vmem:[%s2185_s12 + $0x158] sm:$0xf0]  ;;  %v1992_v22 = vld [vmem:[%s2185_s12 + $0x16c] sm:$0xf] }
  0x2f   : > { %1125 = vmatmul.bf16.vlgmr.msra.gmra.mxu3 %v1543_v43  ;;  %v1628_v43 = vld [vmem:[%s2185_s12 + $0xd0] sm:$0xf0]  ;;  %v1716_v23 = vld [vmem:[%s2185_s12 + $0x178] sm:$0xf0] }
  0x30   : > { %v1631_v49 = vor.u32 %v1971_v42, %v1628_v43 }
  0x3c   : > { %863 = vmatmul.bf16.gmra.mxu0 %v1547_v52  ;;  %v1642_v52 = vld [vmem:[%s2185_s12 + $0xe0] sm:$0xf] }
  0x3d   : > { %952 = vmatmul.bf16.gmra.mxu1 %v1551_v53  ;;  %v1977_v53 = vld [vmem:[%s2185_s12 + $0xec] sm:$0xf0] }
  0x3e   : > { %1041 = vmatmul.bf16.gmra.mxu2 %v1555_v54  ;;  %v1975_v54 = vld [vmem:[%s2185_s12 + $0xe4] sm:$0xf]  ;;  %v1643_v60 = vor.u32 %v1977_v53, %v1642_v52 }
  0x3f   : > { %1130 = vmatmul.bf16.gmra.mxu3 %v1559_v55  ;;  %v1644_v55 = vld [vmem:[%s2185_s12 + $0xf0] sm:$0xf0]  ;;  %v1987_v53 = vld [vmem:[%s2185_s12 + $0x144] sm:$0xf] }
  0x40   : > { %v1647_v61 = vor.u32 %v1975_v54, %v1644_v55  ;;  %v1692_v54 = vld [vmem:[%s2185_s12 + $0x150] sm:$0xf0]  ;;  %v1698_v55 = vld [vmem:[%s2185_s12 + $0x148] sm:$0xf] }
  0x4c   : > { %868 = vmatmul.bf16.gmra.mxu0 %v1563_v0  ;;  %v1658_v0 = vld [vmem:[%s2185_s12 + $0x100] sm:$0xf] }
  0x4d   : > { %957 = vmatmul.bf16.gmra.mxu1 %v1567_v1  ;;  %v1981_v1 = vld [vmem:[%s2185_s12 + $0x10c] sm:$0xf0] }
  0x4e   : > { %1046 = vmatmul.bf16.gmra.mxu2 %v1571_v2  ;;  %v1979_v2 = vld [vmem:[%s2185_s12 + $0x104] sm:$0xf]  ;;  %v1659_v8 = vor.u32 %v1981_v1, %v1658_v0 }
  0x4f   : > { %1135 = vmatmul.bf16.gmra.mxu3 %v1575_v3  ;;  %v1660_v3 = vld [vmem:[%s2185_s12 + $0x110] sm:$0xf0] }
  0x50   : > { %v1663_v9 = vor.u32 %v1979_v2, %v1660_v3  ;;  %v1699_v3 = vor.u32 %v1990_v56, %v1698_v55 }
  0x5c   : > { %873 = vmatmul.bf16.gmra.mxu0 %v1579_v12  ;;  %v1667_v12 = vor.u32 %v1982_v5, %v1666_v4  ;;  %v1703_v4 = vor.u32 %v1988_v57, %v1700_v58 }
  0x5d   : > { %962 = vmatmul.bf16.gmra.mxu1 %v1583_v13  ;;  %v1671_v13 = vor.u32 %v1980_v6, %v1668_v7 }
  0x5e   : > { %1051 = vmatmul.bf16.gmra.mxu2 %v1587_v14 }
  0x5f   : > { %1140 = vmatmul.bf16.gmra.mxu3 %v1591_v15 }
  0x6c   : > { %878 = vmatmul.bf16.gmra.mxu0 %v1595_v24 }
  0x6d   : > { %967 = vmatmul.bf16.gmra.mxu1 %v1599_v25  ;;  %v1983_v25 = vld [vmem:[%s2185_s12 + $0x124] sm:$0xf] }
  0x6e   : > { %1056 = vmatmul.bf16.gmra.mxu2 %v1603_v26  ;;  %v1676_v26 = vld [vmem:[%s2185_s12 + $0x130] sm:$0xf0] }
  0x6f   : > { %1145 = vmatmul.bf16.gmra.mxu3 %v1607_v27  ;;  %v1682_v27 = vld [vmem:[%s2185_s12 + $0x128] sm:$0xf]  ;;  %v1679_v35 = vor.u32 %v1983_v25, %v1676_v26 }
  0x7c   : > { %883 = vmatmul.bf16.gmra.mxu0 %v1611_v36 }
  0x7d   : > { %972 = vmatmul.bf16.gmra.mxu1 %v1615_v37 }
  0x7e   : > { %1061 = vmatmul.bf16.gmra.mxu2 %v1619_v38 }
  0x7f   : > { %1150 = vmatmul.bf16.gmra.mxu3 %v1623_v39  ;;  %v1683_v39 = vor.u32 %v1986_v28, %v1682_v27 }
  0x8c   : > { %888 = vmatmul.bf16.gmra.mxu0 %v1627_v48 }
  0x8d   : > { %977 = vmatmul.bf16.gmra.mxu1 %v1631_v49 }
  0x8e   : > { %1066 = vmatmul.bf16.gmra.mxu2 %v1635_v50  ;;  %v1690_v50 = vld [vmem:[%s2185_s12 + $0x140] sm:$0xf] }
  0x8f   : > { %1155 = vmatmul.bf16.gmra.mxu3 %v1639_v51  ;;  %v1989_v51 = vld [vmem:[%s2185_s12 + $0x14c] sm:$0xf0] }
  0x9c   : > { %893 = vmatmul.bf16.gmra.mxu0 %v1643_v60 }
  0x9d   : > { %982 = vmatmul.bf16.gmra.mxu1 %v1647_v61 }
  0x9e   : > { %1071 = vmatmul.bf16.gmra.mxu2 %v1651_v62  ;;  %v1691_v62 = vor.u32 %v1989_v51, %v1690_v50  ;;  %v1996_v50 = vld [vmem:[%s2185_s12 + $0x18c] sm:$0xf]  ;;  %v1732_v51 = vld [vmem:[%s2185_s12 + $0x198] sm:$0xf0] }
  0x9f   : > { %1160 = vmatmul.bf16.gmra.mxu3 %v1655_v63  ;;  %v1695_v63 = vor.u32 %v1987_v53, %v1692_v54 }
  0xa9   : > { %v859_v10 = vpop.f32.mrf.mxu0 }
  0xaa   : > { %v948_v11 = vpop.f32.mrf.mxu1 }
  0xab   : > { %v949_v14 = vadd.f32 %v948_v11, %v859_v10 }
  0xac   : > { %898 = vmatmul.bf16.gmra.mxu0 %v1659_v8 }
  0xad   : > { %987 = vmatmul.bf16.gmra.mxu1 %v1663_v9 }
  0xae   : > { %1076 = vmatmul.bf16.gmra.mxu2 %v1667_v12 }
  0xaf   : > { %1165 = vmatmul.bf16.gmra.mxu3 %v1671_v13 }
  0xb1   : > { %v1037_v15 = vpop.f32.mrf.mxu2  ;;  %v861_v19 = vpop.f32.mrf.mxu0 }
  0xb2   : > { %v1126_v16 = vpop.f32.mrf.mxu3  ;;  %v1038_v17 = vadd.f32 %v1037_v15, %v949_v14  ;;  %v950_v20 = vpop.f32.mrf.mxu1  ;;  %v1706_v14 = vld [vmem:[%s2185_s12 + $0x160] sm:$0xf]  ;;  %v1993_v15 = vld [vmem:[%s2185_s12 + $0x16c] sm:$0xf0] }
  0xb3   : > { %v951_v31 = vadd.f32 %v950_v20, %v861_v19  ;;  %v1708_v19 = vld [vmem:[%s2185_s12 + $0x170] sm:$0xf0]  ;;  %v1714_v20 = vld [vmem:[%s2185_s12 + $0x168] sm:$0xf]  ;;  %v1707_v27 = vor.u32 %v1993_v15, %v1706_v14  ;;  %v2000_v14 = vld [vmem:[%s2185_s12 + $0x1ac] sm:$0xf] }
  0xb4   : > { %v1127_v21 = vadd.f32 %v1126_v16, %v1038_v17  ;;  %v1991_v17 = vld [vmem:[%s2185_s12 + $0x164] sm:$0xf]  ;;  %v1748_v15 = vld [vmem:[%s2185_s12 + $0x1b8] sm:$0xf0] }
  0xb5   : > { %v1711_v28 = vor.u32 %v1991_v17, %v1708_v19 }
  0xb6   : > { %v1381_v24 = vadd.f32 %v2281_v18, %v1127_v21  ;;  %v1994_v21 = vld [vmem:[%s2185_s12 + $0x174] sm:$0xf0] }
  0xb8   : > { %1413 = vst [vmem:[%s2286_s21] sm:$0xff] %v1381_v24 }
  0xb9   : > { %v1039_v32 = vpop.f32.mrf.mxu2  ;;  %v864_v37 = vpop.f32.mrf.mxu0 }
  0xba   : > { %v1128_v33 = vpop.f32.mrf.mxu3  ;;  %v1040_v36 = vadd.f32 %v1039_v32, %v951_v31  ;;  %v953_v38 = vpop.f32.mrf.mxu1  ;;  %v1715_v32 = vor.u32 %v1994_v21, %v1714_v20 }
  0xbb   : > { %v954_v43 = vadd.f32 %v953_v38, %v864_v37 }
  0xbc   : > { %v1129_v41 = vadd.f32 %v1128_v33, %v1040_v36  ;;  %903 = vmatmul.bf16.gmra.mxu0 %v1675_v34  ;;  %v1719_v33 = vor.u32 %v1992_v22, %v1716_v23 }
  0xbd   : > { %992 = vmatmul.bf16.gmra.mxu1 %v1679_v35 }
  0xbe   : > { %v1382_v42 = vadd.f32 %v2281_v18, %v1129_v41  ;;  %1081 = vmatmul.bf16.gmra.mxu2 %v1683_v39 }
  0xbf   : > { %1170 = vmatmul.bf16.gmra.mxu3 %v1687_v40 }
  0xc0   : > { %1414 = vst [vmem:[%s2286_s21 + $0x8] sm:$0xff] %v1382_v42 }
  0xc1   : > { %v1042_v44 = vpop.f32.mrf.mxu2  ;;  %v866_v47 = vpop.f32.mrf.mxu0 }
  0xc2   : > { %v1131_v45 = vpop.f32.mrf.mxu3  ;;  %v1043_v46 = vadd.f32 %v1042_v44, %v954_v43  ;;  %v955_v48 = vpop.f32.mrf.mxu1  ;;  %v1722_v43 = vld [vmem:[%s2185_s12 + $0x180] sm:$0xf]  ;;  %v1997_v44 = vld [vmem:[%s2185_s12 + $0x18c] sm:$0xf0] }
  0xc3   : > { %v956_v59 = vadd.f32 %v955_v48, %v866_v47  ;;  %v1724_v47 = vld [vmem:[%s2185_s12 + $0x190] sm:$0xf0]  ;;  %v1730_v48 = vld [vmem:[%s2185_s12 + $0x188] sm:$0xf]  ;;  %v1723_v55 = vor.u32 %v1997_v44, %v1722_v43  ;;  %v2004_v43 = vld [vmem:[%s2185_s12 + $0x1cc] sm:$0xf] }
  0xc4   : > { %v1132_v49 = vadd.f32 %v1131_v45, %v1043_v46  ;;  %v1995_v46 = vld [vmem:[%s2185_s12 + $0x184] sm:$0xf]  ;;  %v1764_v44 = vld [vmem:[%s2185_s12 + $0x1d8] sm:$0xf0] }
  0xc5   : > { %v1727_v56 = vor.u32 %v1995_v46, %v1724_v47 }
  0xc6   : > { %v1383_v52 = vadd.f32 %v2281_v18, %v1132_v49  ;;  %v1998_v49 = vld [vmem:[%s2185_s12 + $0x194] sm:$0xf0] }
  0xc8   : > { %1415 = vst [vmem:[%s2286_s21 + $0x10] sm:$0xff] %v1383_v52 }
  0xc9   : > { %v1044_v60 = vpop.f32.mrf.mxu2  ;;  %v869_v1 = vpop.f32.mrf.mxu0 }
  0xca   : > { %v1133_v61 = vpop.f32.mrf.mxu3  ;;  %v1045_v0 = vadd.f32 %v1044_v60, %v956_v59  ;;  %v958_v2 = vpop.f32.mrf.mxu1  ;;  %v1731_v60 = vor.u32 %v1998_v49, %v1730_v48 }
  0xcb   : > { %v959_v7 = vadd.f32 %v958_v2, %v869_v1 }
  0xcc   : > { %v1134_v5 = vadd.f32 %v1133_v61, %v1045_v0  ;;  %908 = vmatmul.bf16.gmra.mxu0 %v1691_v62  ;;  %v1735_v61 = vor.u32 %v1996_v50, %v1732_v51 }
  0xcd   : > { %997 = vmatmul.bf16.gmra.mxu1 %v1695_v63 }
  0xce   : > { %v1384_v6 = vadd.f32 %v2281_v18, %v1134_v5  ;;  %1086 = vmatmul.bf16.gmra.mxu2 %v1699_v3 }
  0xcf   : > { %1175 = vmatmul.bf16.gmra.mxu3 %v1703_v4 }
  0xd0   : > { %1416 = vst [vmem:[%s2286_s21 + $0x18] sm:$0xff] %v1384_v6 }
  0xd1   : > { %v1047_v8 = vpop.f32.mrf.mxu2  ;;  %v871_v11 = vpop.f32.mrf.mxu0 }
  0xd2   : > { %v1136_v9 = vpop.f32.mrf.mxu3  ;;  %v1048_v10 = vadd.f32 %v1047_v8, %v959_v7  ;;  %v960_v12 = vpop.f32.mrf.mxu1  ;;  %v1738_v7 = vld [vmem:[%s2185_s12 + $0x1a0] sm:$0xf]  ;;  %v2001_v8 = vld [vmem:[%s2185_s12 + $0x1ac] sm:$0xf0] }
  0xd3   : > { %v961_v24 = vadd.f32 %v960_v12, %v871_v11  ;;  %v1740_v11 = vld [vmem:[%s2185_s12 + $0x1b0] sm:$0xf0]  ;;  %v1746_v12 = vld [vmem:[%s2185_s12 + $0x1a8] sm:$0xf]  ;;  %v1739_v20 = vor.u32 %v2001_v8, %v1738_v7  ;;  %v2008_v7 = vld [vmem:[%s2185_s12 + $0x1ec] sm:$0xf] }
  0xd4   : > { %v1137_v13 = vadd.f32 %v1136_v9, %v1048_v10  ;;  %v1999_v10 = vld [vmem:[%s2185_s12 + $0x1a4] sm:$0xf]  ;;  %v1780_v8 = vld [vmem:[%s2185_s12 + $0x1f8] sm:$0xf0] }
  0xd5   : > { %v1743_v21 = vor.u32 %v1999_v10, %v1740_v11 }
  0xd6   : > { %v1385_v16 = vadd.f32 %v2281_v18, %v1137_v13  ;;  %v2002_v13 = vld [vmem:[%s2185_s12 + $0x1b4] sm:$0xf0] }
  0xd8   : > { %1417 = vst [vmem:[%s2286_s21 + $0x20] sm:$0xff] %v1385_v16 }
  0xd9   : > { %v1049_v25 = vpop.f32.mrf.mxu2  ;;  %v874_v30 = vpop.f32.mrf.mxu0 }
  0xda   : > { %v1138_v26 = vpop.f32.mrf.mxu3  ;;  %v1050_v29 = vadd.f32 %v1049_v25, %v961_v24  ;;  %v963_v31 = vpop.f32.mrf.mxu1  ;;  %v1747_v25 = vor.u32 %v2002_v13, %v1746_v12 }
  0xdb   : > { %v964_v36 = vadd.f32 %v963_v31, %v874_v30 }
  0xdc   : > { %v1139_v34 = vadd.f32 %v1138_v26, %v1050_v29  ;;  %913 = vmatmul.bf16.gmra.mxu0 %v1707_v27  ;;  %v1751_v26 = vor.u32 %v2000_v14, %v1748_v15 }
  0xdd   : > { %1002 = vmatmul.bf16.gmra.mxu1 %v1711_v28 }
  0xde   : > { %v1386_v35 = vadd.f32 %v2281_v18, %v1139_v34  ;;  %1091 = vmatmul.bf16.gmra.mxu2 %v1715_v32 }
  0xdf   : > { %1180 = vmatmul.bf16.gmra.mxu3 %v1719_v33 }
  0xe0   : > { %1418 = vst [vmem:[%s2286_s21 + $0x28] sm:$0xff] %v1386_v35 }
  0xe1   : > { %v1052_v37 = vpop.f32.mrf.mxu2  ;;  %v876_v40 = vpop.f32.mrf.mxu0 }
  0xe2   : > { %v1141_v38 = vpop.f32.mrf.mxu3  ;;  %v1053_v39 = vadd.f32 %v1052_v37, %v964_v36  ;;  %v965_v41 = vpop.f32.mrf.mxu1  ;;  %v1754_v36 = vld [vmem:[%s2185_s12 + $0x1c0] sm:$0xf]  ;;  %v2005_v37 = vld [vmem:[%s2185_s12 + $0x1cc] sm:$0xf0] }
  0xe3   : > { %v966_v52 = vadd.f32 %v965_v41, %v876_v40  ;;  %v1756_v40 = vld [vmem:[%s2185_s12 + $0x1d0] sm:$0xf0]  ;;  %v1762_v41 = vld [vmem:[%s2185_s12 + $0x1c8] sm:$0xf]  ;;  %v1755_v48 = vor.u32 %v2005_v37, %v1754_v36 }
  0xe4   : > { %v1142_v42 = vadd.f32 %v1141_v38, %v1053_v39  ;;  %v2003_v39 = vld [vmem:[%s2185_s12 + $0x1c4] sm:$0xf] }
  0xe5   : > { %v1759_v49 = vor.u32 %v2003_v39, %v1756_v40 }
  0xe6   : > { %v1387_v45 = vadd.f32 %v2281_v18, %v1142_v42  ;;  %v2006_v42 = vld [vmem:[%s2185_s12 + $0x1d4] sm:$0xf0] }
  0xe8   : > { %1419 = vst [vmem:[%s2286_s21 + $0x30] sm:$0xff] %v1387_v45 }
  0xe9   : > { %v1054_v53 = vpop.f32.mrf.mxu2  ;;  %v879_v58 = vpop.f32.mrf.mxu0 }
  0xea   : > { %v1143_v54 = vpop.f32.mrf.mxu3  ;;  %v1055_v57 = vadd.f32 %v1054_v53, %v966_v52  ;;  %v968_v59 = vpop.f32.mrf.mxu1  ;;  %v1763_v53 = vor.u32 %v2006_v42, %v1762_v41 }
  0xeb   : > { %v969_v0 = vadd.f32 %v968_v59, %v879_v58 }
  0xec   : > { %v1144_v62 = vadd.f32 %v1143_v54, %v1055_v57  ;;  %918 = vmatmul.bf16.gmra.mxu0 %v1723_v55  ;;  %v1767_v54 = vor.u32 %v2004_v43, %v1764_v44 }
  0xed   : > { %1007 = vmatmul.bf16.gmra.mxu1 %v1727_v56 }
  0xee   : > { %v1388_v63 = vadd.f32 %v2281_v18, %v1144_v62  ;;  %1096 = vmatmul.bf16.gmra.mxu2 %v1731_v60 }
  0xef   : > { %1185 = vmatmul.bf16.gmra.mxu3 %v1735_v61 }
  0xf0   : > { %1420 = vst [vmem:[%s2286_s21 + $0x38] sm:$0xff] %v1388_v63 }
  0xf1   : > { %v1057_v1 = vpop.f32.mrf.mxu2  ;;  %v881_v4 = vpop.f32.mrf.mxu0 }
  0xf2   : > { %v1146_v2 = vpop.f32.mrf.mxu3  ;;  %v1058_v3 = vadd.f32 %v1057_v1, %v969_v0  ;;  %v970_v5 = vpop.f32.mrf.mxu1  ;;  %v1770_v0 = vld [vmem:[%s2185_s12 + $0x1e0] sm:$0xf]  ;;  %v2009_v1 = vld [vmem:[%s2185_s12 + $0x1ec] sm:$0xf0] }
  0xf3   : > { %v971_v16 = vadd.f32 %v970_v5, %v881_v4  ;;  %v1772_v4 = vld [vmem:[%s2185_s12 + $0x1f0] sm:$0xf0]  ;;  %v1778_v5 = vld [vmem:[%s2185_s12 + $0x1e8] sm:$0xf]  ;;  %v1771_v12 = vor.u32 %v2009_v1, %v1770_v0 }
  0xf4   : > { %v1147_v6 = vadd.f32 %v1146_v2, %v1058_v3  ;;  %v2007_v3 = vld [vmem:[%s2185_s12 + $0x1e4] sm:$0xf] }
  0xf5   : > { %v1775_v13 = vor.u32 %v2007_v3, %v1772_v4 }
  0xf6   : > { %v1389_v9 = vadd.f32 %v2281_v18, %v1147_v6  ;;  %v2010_v6 = vld [vmem:[%s2185_s12 + $0x1f4] sm:$0xf0] }
  0xf8   : > { %1421 = vst [vmem:[%s2286_s21 + $0x40] sm:$0xff] %v1389_v9 }
  0xf9   : > { %v1059_v17 = vpop.f32.mrf.mxu2  ;;  %v884_v23 = vpop.f32.mrf.mxu0 }
  0xfa   : > { %v1148_v19 = vpop.f32.mrf.mxu3  ;;  %v1060_v22 = vadd.f32 %v1059_v17, %v971_v16  ;;  %v973_v24 = vpop.f32.mrf.mxu1  ;;  %v1779_v17 = vor.u32 %v2010_v6, %v1778_v5 }
  0xfb   : > { %v974_v29 = vadd.f32 %v973_v24, %v884_v23 }
  0xfc   : > { %v1149_v27 = vadd.f32 %v1148_v19, %v1060_v22  ;;  %923 = vmatmul.bf16.gmra.mxu0 %v1739_v20  ;;  %v1783_v19 = vor.u32 %v2008_v7, %v1780_v8 }
  0xfd   : > { %1012 = vmatmul.bf16.gmra.mxu1 %v1743_v21 }
  0xfe   : > { %v1390_v28 = vadd.f32 %v2281_v18, %v1149_v27  ;;  %1101 = vmatmul.bf16.gmra.mxu2 %v1747_v25 }
  0xff   : > { %1190 = vmatmul.bf16.gmra.mxu3 %v1751_v26 }
 0x100   : > { %1422 = vst [vmem:[%s2286_s21 + $0x48] sm:$0xff] %v1390_v28 }
 0x101   : > { %v1062_v30 = vpop.f32.mrf.mxu2  ;;  %v886_v33 = vpop.f32.mrf.mxu0 }
 0x102   : > { %v1151_v31 = vpop.f32.mrf.mxu3  ;;  %v1063_v32 = vadd.f32 %v1062_v30, %v974_v29  ;;  %v975_v34 = vpop.f32.mrf.mxu1 }
 0x103   : > { %v976_v45 = vadd.f32 %v975_v34, %v886_v33 }
 0x104   : > { %v1152_v35 = vadd.f32 %v1151_v31, %v1063_v32 }
 0x106   : > { %v1391_v38 = vadd.f32 %v2281_v18, %v1152_v35 }
 0x108   : > { %1423 = vst [vmem:[%s2286_s21 + $0x50] sm:$0xff] %v1391_v38 }
 0x109   : > { %v1064_v46 = vpop.f32.mrf.mxu2  ;;  %v889_v51 = vpop.f32.mrf.mxu0 }
 0x10a   : > { %v1153_v47 = vpop.f32.mrf.mxu3  ;;  %v1065_v50 = vadd.f32 %v1064_v46, %v976_v45  ;;  %v978_v52 = vpop.f32.mrf.mxu1 }
 0x10b   : > { %v979_v57 = vadd.f32 %v978_v52, %v889_v51 }
 0x10c   : > { %v1154_v55 = vadd.f32 %v1153_v47, %v1065_v50  ;;  %928 = vmatmul.bf16.gmra.mxu0 %v1755_v48 }
 0x10d   : > { %1017 = vmatmul.bf16.gmra.mxu1 %v1759_v49 }
 0x10e   : > { %v1392_v56 = vadd.f32 %v2281_v18, %v1154_v55  ;;  %1106 = vmatmul.bf16.gmra.mxu2 %v1763_v53 }
 0x10f   : > { %1195 = vmatmul.bf16.gmra.mxu3 %v1767_v54 }
 0x110   : > { %1424 = vst [vmem:[%s2286_s21 + $0x58] sm:$0xff] %v1392_v56 }
 0x111   : > { %v1067_v58 = vpop.f32.mrf.mxu2  ;;  %v891_v61 = vpop.f32.mrf.mxu0 }
 0x112   : > { %v1156_v59 = vpop.f32.mrf.mxu3  ;;  %v1068_v60 = vadd.f32 %v1067_v58, %v979_v57  ;;  %v980_v62 = vpop.f32.mrf.mxu1 }
 0x113   : > { %v981_v9 = vadd.f32 %v980_v62, %v891_v61 }
 0x114   : > { %v1157_v63 = vadd.f32 %v1156_v59, %v1068_v60 }
 0x116   : > { %v1393_v2 = vadd.f32 %v2281_v18, %v1157_v63 }
 0x118   : > { %1425 = vst [vmem:[%s2286_s21 + $0x60] sm:$0xff] %v1393_v2 }
 0x119   : > { %v1069_v10 = vpop.f32.mrf.mxu2  ;;  %v894_v15 = vpop.f32.mrf.mxu0 }
 0x11a   : > { %v1158_v11 = vpop.f32.mrf.mxu3  ;;  %v1070_v14 = vadd.f32 %v1069_v10, %v981_v9  ;;  %v983_v16 = vpop.f32.mrf.mxu1 }
 0x11b   : > { %v984_v22 = vadd.f32 %v983_v16, %v894_v15 }
 0x11c   : > { %v1159_v20 = vadd.f32 %v1158_v11, %v1070_v14  ;;  %933 = vmatmul.bf16.gmra.mxu0 %v1771_v12 }
 0x11d   : > { %1022 = vmatmul.bf16.gmra.mxu1 %v1775_v13 }
 0x11e   : > { %v1394_v21 = vadd.f32 %v2281_v18, %v1159_v20  ;;  %1111 = vmatmul.bf16.gmra.mxu2 %v1779_v17 }
 0x11f   : > { %1200 = vmatmul.bf16.gmra.mxu3 %v1783_v19 }
 0x120   : > { %1426 = vst [vmem:[%s2286_s21 + $0x68] sm:$0xff] %v1394_v21 }
 0x121   : > { %v1072_v23 = vpop.f32.mrf.mxu2  ;;  %v896_v26 = vpop.f32.mrf.mxu0 }
 0x122   : > { %v1161_v24 = vpop.f32.mrf.mxu3  ;;  %v1073_v25 = vadd.f32 %v1072_v23, %v984_v22  ;;  %v985_v27 = vpop.f32.mrf.mxu1 }
 0x123   : > { %v986_v30 = vadd.f32 %v985_v27, %v896_v26 }
 0x124   : > { %v1162_v28 = vadd.f32 %v1161_v24, %v1073_v25 }
 0x126   : > { %v1395_v29 = vadd.f32 %v2281_v18, %v1162_v28 }
 0x128   : > { %1427 = vst [vmem:[%s2286_s21 + $0x70] sm:$0xff] %v1395_v29 }
 0x129   : > { %v1074_v31 = vpop.f32.mrf.mxu2  ;;  %v899_v34 = vpop.f32.mrf.mxu0 }
 0x12a   : > { %v1163_v32 = vpop.f32.mrf.mxu3  ;;  %v1075_v33 = vadd.f32 %v1074_v31, %v986_v30  ;;  %v988_v35 = vpop.f32.mrf.mxu1 }
 0x12b   : > { %v989_v38 = vadd.f32 %v988_v35, %v899_v34 }
 0x12c   : > { %v1164_v36 = vadd.f32 %v1163_v32, %v1075_v33 }
 0x12e   : > { %v1396_v37 = vadd.f32 %v2281_v18, %v1164_v36 }
 0x130   : > { %1428 = vst [vmem:[%s2286_s21 + $0x78] sm:$0xff] %v1396_v37 }
 0x131   : > { %v1077_v39 = vpop.f32.mrf.mxu2  ;;  %v901_v42 = vpop.f32.mrf.mxu0 }
 0x132   : > { %v1166_v40 = vpop.f32.mrf.mxu3  ;;  %v1078_v41 = vadd.f32 %v1077_v39, %v989_v38  ;;  %v990_v43 = vpop.f32.mrf.mxu1 }
 0x133   : > { %v991_v46 = vadd.f32 %v990_v43, %v901_v42 }
 0x134   : > { %v1167_v44 = vadd.f32 %v1166_v40, %v1078_v41 }
 0x136   : > { %v1397_v45 = vadd.f32 %v2281_v18, %v1167_v44 }
 0x138   : > { %1429 = vst [vmem:[%s2286_s21 + $0x80] sm:$0xff] %v1397_v45 }
 0x139   : > { %v1079_v47 = vpop.f32.mrf.mxu2  ;;  %v904_v50 = vpop.f32.mrf.mxu0 }
 0x13a   : > { %v1168_v48 = vpop.f32.mrf.mxu3  ;;  %v1080_v49 = vadd.f32 %v1079_v47, %v991_v46  ;;  %v993_v51 = vpop.f32.mrf.mxu1 }
 0x13b   : > { %v994_v54 = vadd.f32 %v993_v51, %v904_v50 }
 0x13c   : > { %v1169_v52 = vadd.f32 %v1168_v48, %v1080_v49 }
 0x13e   : > { %v1398_v53 = vadd.f32 %v2281_v18, %v1169_v52 }
 0x140   : > { %1430 = vst [vmem:[%s2286_s21 + $0x88] sm:$0xff] %v1398_v53 }
 0x141   : > { %v1082_v55 = vpop.f32.mrf.mxu2  ;;  %v906_v58 = vpop.f32.mrf.mxu0 }
 0x142   : > { %v1171_v56 = vpop.f32.mrf.mxu3  ;;  %v1083_v57 = vadd.f32 %v1082_v55, %v994_v54  ;;  %v995_v59 = vpop.f32.mrf.mxu1 }
 0x143   : > { %v996_v62 = vadd.f32 %v995_v59, %v906_v58 }
 0x144   : > { %v1172_v60 = vadd.f32 %v1171_v56, %v1083_v57 }
 0x146   : > { %v1399_v61 = vadd.f32 %v2281_v18, %v1172_v60 }
 0x148   : > { %1431 = vst [vmem:[%s2286_s21 + $0x90] sm:$0xff] %v1399_v61 }
 0x149   : > { %v1084_v63 = vpop.f32.mrf.mxu2  ;;  %v909_v2 = vpop.f32.mrf.mxu0 }
 0x14a   : > { %v1173_v0 = vpop.f32.mrf.mxu3  ;;  %v1085_v1 = vadd.f32 %v1084_v63, %v996_v62  ;;  %v998_v3 = vpop.f32.mrf.mxu1 }
 0x14b   : > { %v999_v6 = vadd.f32 %v998_v3, %v909_v2 }
 0x14c   : > { %v1174_v4 = vadd.f32 %v1173_v0, %v1085_v1 }
 0x14e   : > { %v1400_v5 = vadd.f32 %v2281_v18, %v1174_v4 }
 0x150   : > { %1432 = vst [vmem:[%s2286_s21 + $0x98] sm:$0xff] %v1400_v5 }
 0x151   : > { %v1087_v7 = vpop.f32.mrf.mxu2  ;;  %v911_v10 = vpop.f32.mrf.mxu0 }
 0x152   : > { %v1176_v8 = vpop.f32.mrf.mxu3  ;;  %v1088_v9 = vadd.f32 %v1087_v7, %v999_v6  ;;  %v1000_v11 = vpop.f32.mrf.mxu1 }
 0x153   : > { %v1001_v14 = vadd.f32 %v1000_v11, %v911_v10 }
 0x154   : > { %v1177_v12 = vadd.f32 %v1176_v8, %v1088_v9 }
 0x156   : > { %v1401_v13 = vadd.f32 %v2281_v18, %v1177_v12 }
 0x158   : > { %1433 = vst [vmem:[%s2286_s21 + $0xa0] sm:$0xff] %v1401_v13 }
 0x159   : > { %v1089_v15 = vpop.f32.mrf.mxu2  ;;  %v914_v19 = vpop.f32.mrf.mxu0 }
 0x15a   : > { %v1178_v16 = vpop.f32.mrf.mxu3  ;;  %v1090_v17 = vadd.f32 %v1089_v15, %v1001_v14  ;;  %v1003_v20 = vpop.f32.mrf.mxu1 }
 0x15b   : > { %v1004_v23 = vadd.f32 %v1003_v20, %v914_v19 }
 0x15c   : > { %v1179_v21 = vadd.f32 %v1178_v16, %v1090_v17 }
 0x15e   : > { %v1402_v22 = vadd.f32 %v2281_v18, %v1179_v21 }
 0x160   : > { %1434 = vst [vmem:[%s2286_s21 + $0xa8] sm:$0xff] %v1402_v22 }
 0x161   : > { %v1092_v24 = vpop.f32.mrf.mxu2  ;;  %v916_v27 = vpop.f32.mrf.mxu0 }
 0x162   : > { %v1181_v25 = vpop.f32.mrf.mxu3  ;;  %v1093_v26 = vadd.f32 %v1092_v24, %v1004_v23  ;;  %v1005_v28 = vpop.f32.mrf.mxu1 }
 0x163   : > { %v1006_v31 = vadd.f32 %v1005_v28, %v916_v27 }
 0x164   : > { %v1182_v29 = vadd.f32 %v1181_v25, %v1093_v26 }
 0x166   : > { %v1403_v30 = vadd.f32 %v2281_v18, %v1182_v29 }
 0x168   : > { %1435 = vst [vmem:[%s2286_s21 + $0xb0] sm:$0xff] %v1403_v30 }
 0x169   : > { %v1094_v32 = vpop.f32.mrf.mxu2  ;;  %v919_v35 = vpop.f32.mrf.mxu0 }
 0x16a   : > { %v1183_v33 = vpop.f32.mrf.mxu3  ;;  %v1095_v34 = vadd.f32 %v1094_v32, %v1006_v31  ;;  %v1008_v36 = vpop.f32.mrf.mxu1 }
 0x16b   : > { %v1009_v39 = vadd.f32 %v1008_v36, %v919_v35 }
 0x16c   : > { %v1184_v37 = vadd.f32 %v1183_v33, %v1095_v34 }
 0x16e   : > { %v1404_v38 = vadd.f32 %v2281_v18, %v1184_v37 }
 0x170   : > { %1436 = vst [vmem:[%s2286_s21 + $0xb8] sm:$0xff] %v1404_v38 }
 0x171   : > { %v1097_v40 = vpop.f32.mrf.mxu2  ;;  %v921_v43 = vpop.f32.mrf.mxu0 }
 0x172   : > { %v1186_v41 = vpop.f32.mrf.mxu3  ;;  %v1098_v42 = vadd.f32 %v1097_v40, %v1009_v39  ;;  %v1010_v44 = vpop.f32.mrf.mxu1 }
 0x173   : > { %v1011_v47 = vadd.f32 %v1010_v44, %v921_v43 }
 0x174   : > { %v1187_v45 = vadd.f32 %v1186_v41, %v1098_v42 }
 0x176   : > { %v1405_v46 = vadd.f32 %v2281_v18, %v1187_v45 }
 0x178   : > { %1437 = vst [vmem:[%s2286_s21 + $0xc0] sm:$0xff] %v1405_v46 }
 0x179   : > { %v1099_v48 = vpop.f32.mrf.mxu2  ;;  %v924_v51 = vpop.f32.mrf.mxu0 }
 0x17a   : > { %v1188_v49 = vpop.f32.mrf.mxu3  ;;  %v1100_v50 = vadd.f32 %v1099_v48, %v1011_v47  ;;  %v1013_v52 = vpop.f32.mrf.mxu1 }
 0x17b   : > { %v1014_v55 = vadd.f32 %v1013_v52, %v924_v51 }
 0x17c   : > { %v1189_v53 = vadd.f32 %v1188_v49, %v1100_v50 }
 0x17e   : > { %v1406_v54 = vadd.f32 %v2281_v18, %v1189_v53 }
 0x180   : > { %1438 = vst [vmem:[%s2286_s21 + $0xc8] sm:$0xff] %v1406_v54 }
 0x181   : > { %v1102_v56 = vpop.f32.mrf.mxu2  ;;  %v926_v59 = vpop.f32.mrf.mxu0 }
 0x182   : > { %v1191_v57 = vpop.f32.mrf.mxu3  ;;  %v1103_v58 = vadd.f32 %v1102_v56, %v1014_v55  ;;  %v1015_v60 = vpop.f32.mrf.mxu1 }
 0x183   : > { %v1016_v63 = vadd.f32 %v1015_v60, %v926_v59 }
 0x184   : > { %v1192_v61 = vadd.f32 %v1191_v57, %v1103_v58 }
 0x186   : > { %v1407_v62 = vadd.f32 %v2281_v18, %v1192_v61 }
 0x188   : > { %1439 = vst [vmem:[%s2286_s21 + $0xd0] sm:$0xff] %v1407_v62 }
 0x189   : > { %v1104_v0 = vpop.f32.mrf.mxu2  ;;  %v929_v3 = vpop.f32.mrf.mxu0 }
 0x18a   : > { %v1193_v1 = vpop.f32.mrf.mxu3  ;;  %v1105_v2 = vadd.f32 %v1104_v0, %v1016_v63  ;;  %v1018_v4 = vpop.f32.mrf.mxu1 }
 0x18b   : > { %v1019_v7 = vadd.f32 %v1018_v4, %v929_v3 }
 0x18c   : > { %v1194_v5 = vadd.f32 %v1193_v1, %v1105_v2 }
 0x18e   : > { %v1408_v6 = vadd.f32 %v2281_v18, %v1194_v5 }
 0x190   : > { %1440 = vst [vmem:[%s2286_s21 + $0xd8] sm:$0xff] %v1408_v6 }
 0x191   : > { %v1107_v8 = vpop.f32.mrf.mxu2  ;;  %v931_v11 = vpop.f32.mrf.mxu0 }
 0x192   : > { %v1196_v9 = vpop.f32.mrf.mxu3  ;;  %v1108_v10 = vadd.f32 %v1107_v8, %v1019_v7  ;;  %v1020_v12 = vpop.f32.mrf.mxu1 }
 0x193   : > { %v1021_v15 = vadd.f32 %v1020_v12, %v931_v11 }
 0x194   : > { %v1197_v13 = vadd.f32 %v1196_v9, %v1108_v10 }
 0x196   : > { %v1409_v14 = vadd.f32 %v2281_v18, %v1197_v13 }
 0x198   : > { %1441 = vst [vmem:[%s2286_s21 + $0xe0] sm:$0xff] %v1409_v14 }
 0x199   : > { %v1109_v16 = vpop.f32.mrf.mxu2  ;;  %v934_v20 = vpop.f32.mrf.mxu0 }
 0x19a   : > { %v1198_v17 = vpop.f32.mrf.mxu3  ;;  %v1110_v19 = vadd.f32 %v1109_v16, %v1021_v15  ;;  %v1023_v21 = vpop.f32.mrf.mxu1 }
 0x19b   : > { %v1024_v24 = vadd.f32 %v1023_v21, %v934_v20 }
 0x19c   : > { %v1199_v22 = vadd.f32 %v1198_v17, %v1110_v19 }
 0x19e   : > { %v1410_v23 = vadd.f32 %v2281_v18, %v1199_v22 }
 0x1a0   : > { %1442 = vst [vmem:[%s2286_s21 + $0xe8] sm:$0xff] %v1410_v23 }
 0x1a1   : > { %v1112_v25 = vpop.f32.mrf.mxu2  ;;  %v936_v29 = vpop.f32.mrf.mxu0 }
 0x1a2   : > { %v1201_v26 = vpop.f32.mrf.mxu3  ;;  %v1113_v27 = vadd.f32 %v1112_v25, %v1024_v24  ;;  %v1025_v30 = vpop.f32.mrf.mxu1 }
 0x1a3   : > { %v1026_v32 = vadd.f32 %v1025_v30, %v936_v29 }
 0x1a4   : > { %v1202_v28 = vadd.f32 %v1201_v26, %v1113_v27 }
 0x1a6   : > { %v1411_v31 = vadd.f32 %v2281_v18, %v1202_v28 }
 0x1a8   : > { %1443 = vst [vmem:[%s2286_s21 + $0xf0] sm:$0xff] %v1411_v31 }
 0x1a9   : > { %v1114_v33 = vpop.f32.mrf.mxu2 }
 0x1aa   : > { %v1115_v34 = vadd.f32 %v1114_v33, %v1026_v32  ;;  %v1203_v35 = vpop.f32.mrf.mxu3 }
 0x1ac   : > { %v1204_v36 = vadd.f32 %v1203_v35, %v1115_v34 }
 0x1ae   : > { %v1412_v37 = vadd.f32 %v2281_v18, %v1204_v36 }
 0x1b0   : > { %1444 = vst [vmem:[%s2286_s21 + $0xf8] sm:$0xff] %v1412_v37 }
 0x1b1 PF: > { %s13_s14 = sadd.s32 1, %s2058_s14   ;;  %s2421_s12 = smov %s2054_s13 }
 0x1b2   : > { %p10_p5 = scmp.ge.s32.totalorder %s13_s14, 4   ;;  %s2422_s13 = smov %s2424_s15 }
 0x1b4   :  { %12 = sbr.rel (!%p10_p5) target bundleno = 2 (0x2), region = 75 }

// kernel: trainnet_forward.2
= control target key start
LH: loop header
LB: loop body
LE: loop exit
PB: predicated region body
PF: predicated region fallthrough
CT: control target
= control target key end

     0   :  { %s2705_s18 = smov 0   ;;  %s2707_s19 = smov 0   ;;  %s3122_s0 = inlined_call_operand.vmem [shape: bf16[512,512], index: 0, kind: input, shape index: {}]   ;;  %s3123_s1 = inlined_call_operand.vmem [shape: bf16[512,128], index: 1, kind: input, shape index: {}]   ;;  %s3124_s2 = inlined_call_operand.vmem [shape: bf16[128,128], index: 2, kind: input, shape index: {}]   ;;  %s3125_s3 = inlined_call_operand.vmem [shape: f32[1,128], index: 3, kind: input, shape index: {}]   ;;  %s3126_s4 = inlined_call_operand.vmem [shape: bf16[128,128], index: 4, kind: input, shape index: {}]   ;;  %s3127_s5 = inlined_call_operand.vmem [shape: bf16[512,128], index: 5, kind: output, shape index: {}]  }
   0x1   :  { %s2709_s20 = smov 0  }
   0x2 LB: > { %s27_s21 = sadd.s32 1, %s2669_s19  ;;  %p1946_p0 = scmp.ge.s32.totalorder %s2673_s20, 1  ;;  %s2673_s20 = sphi %s2709_s20, %s15_s20   ;;  %s2669_s19 = sphi %s2707_s19, %s3129_s19   ;;  %s2665_s18 = sphi %s2705_s18, %s3128_s18  }
   0x3   : > { %p29_p1 = scmp.ge.s32.totalorder %s27_s21, 2  ;;  %p208_p2 = scmp.lt.s32.totalorder %s2673_s20, 3 }
   0x5   : > { %s3131_s21 = smov (%p29_p1, %s27_s21), 0  ;;  %p209_p3 = pnand %p1946_p0, %p208_p2 }
   0x6   : > { %s1947_s9 = sshll.u32 (!%p209_p3), %s2665_s18, 5 }
   0x7   : > { %212 = sbr.rel (%p209_p3) target bundleno = 835 (0x343), region = 40  ;;  %p243_p4 = scmp.lt.s32.totalorder (!%p209_p3), %s1947_s9, 63 }
   0xc   : > { %v2410_v0 = vld [vmem:[%s3123_s1 + $0x38] sm:$0xff]  ;;  %v2409_v2 = vld [vmem:[%s3123_s1 + $0x30] sm:$0xff]  ;;  %v2408_v4 = vld [vmem:[%s3123_s1 + $0x28] sm:$0xff]  ;;  %s3133_s9 = smov (!%p243_p4, %s1947_s9), 63 }
   0xd   : > { %v2418_v1 = vld [vmem:[%s3123_s1 + $0x78] sm:$0xff]  ;;  %2610 = vmatpush.bf16.msra.mxu2 %v2410_v0  ;;  %v2417_v3 = vld [vmem:[%s3123_s1 + $0x70] sm:$0xff]  ;;  %904 = vmatpush.bf16.msra.mxu0 %v2410_v0  ;;  %v2416_v5 = vld [vmem:[%s3123_s1 + $0x68] sm:$0xff]  ;;  %s2402_s25 = sshll.u32 %s3133_s9, 4  ;;  %s1951_s18 = sshll.u32 %s3133_s9, 2 }
   0xe   : > { %2618 = vmatpush.bf16.msra.mxu3 %v2418_v1  ;;  %993 = vmatpush.bf16.msra.mxu1 %v2418_v1  ;;  %v2407_v6 = vld [vmem:[%s3123_s1 + $0x20] sm:$0xff]  ;;  %v2406_v8 = vld [vmem:[%s3123_s1 + $0x18] sm:$0xff]  ;;  %v2405_v10 = vld [vmem:[%s3123_s1 + $0x10] sm:$0xff]  ;;  %s2774_s7 = scalar_lea.vmem %s3122_s0, %s2402_s25  ;;  %s3081_s24 = scalar_lea.vmem %s3127_s5, %s1951_s18 }
   0xf   : > { %v2415_v7 = vld [vmem:[%s3123_s1 + $0x60] sm:$0xff]  ;;  %v2414_v9 = vld [vmem:[%s3123_s1 + $0x58] sm:$0xff]  ;;  %v2413_v11 = vld [vmem:[%s3123_s1 + $0x50] sm:$0xff] }
  0x10   : > { %v2404_v12 = vld [vmem:[%s3123_s1 + $0x8] sm:$0xff]  ;;  %v2403_v14 = vld [vmem:[%s3123_s1] sm:$0xff]  ;;  %v2469_v17 = vld [vmem:[%s2774_s7 + $0x10c] sm:$0xf0] }
  0x11   : > { %2611 = vmatpush.bf16.msra.mxu2 %v2409_v2  ;;  %905 = vmatpush.bf16.msra.mxu0 %v2409_v2  ;;  %v2412_v13 = vld [vmem:[%s3123_s1 + $0x48] sm:$0xff]  ;;  %v2411_v15 = vld [vmem:[%s3123_s1 + $0x40] sm:$0xff]  ;;  %v2084_v19 = vld [vmem:[%s2774_s7 + $0x110] sm:$0xf0] }
  0x12   : > { %2619 = vmatpush.bf16.msra.mxu3 %v2417_v3  ;;  %994 = vmatpush.bf16.msra.mxu1 %v2417_v3  ;;  %v2082_v16 = vld [vmem:[%s2774_s7 + $0x100] sm:$0xf]  ;;  %v2467_v18 = vld [vmem:[%s2774_s7 + $0x104] sm:$0xf]  ;;  %v2426_v20 = vld [vmem:[%s3123_s1 + $0xb8] sm:$0xff] }
  0x13   : > { %v2434_v21 = vld [vmem:[%s3123_s1 + $0xf8] sm:$0xff]  ;;  %v2083_v22 = vor.u32 %v2469_v17, %v2082_v16  ;;  %v2087_v23 = vor.u32 %v2467_v18, %v2084_v19  ;;  %v2425_v24 = vld [vmem:[%s3123_s1 + $0xb0] sm:$0xff]  ;;  %v2424_v26 = vld [vmem:[%s3123_s1 + $0xa8] sm:$0xff] }
  0x14   : > { %v2433_v25 = vld [vmem:[%s3123_s1 + $0xf0] sm:$0xff]  ;;  %v2432_v27 = vld [vmem:[%s3123_s1 + $0xe8] sm:$0xff]  ;;  %v2098_v28 = vld [vmem:[%s2774_s7 + $0x120] sm:$0xf] }
  0x15   : > { %2612 = vmatpush.bf16.msra.mxu2 %v2408_v4  ;;  %906 = vmatpush.bf16.msra.mxu0 %v2408_v4  ;;  %v2473_v29 = vld [vmem:[%s2774_s7 + $0x12c] sm:$0xf0]  ;;  %v2471_v30 = vld [vmem:[%s2774_s7 + $0x124] sm:$0xf]  ;;  %v2100_v31 = vld [vmem:[%s2774_s7 + $0x130] sm:$0xf0] }
  0x16   : > { %2620 = vmatpush.bf16.msra.mxu3 %v2416_v5  ;;  %995 = vmatpush.bf16.msra.mxu1 %v2416_v5  ;;  %v2099_v32 = vor.u32 %v2473_v29, %v2098_v28  ;;  %v2103_v33 = vor.u32 %v2471_v30, %v2100_v31  ;;  %v2423_v34 = vld [vmem:[%s3123_s1 + $0xa0] sm:$0xff]  ;;  %v2477_v37 = vld [vmem:[%s2774_s7 + $0x14c] sm:$0xf0]  ;;  %v2116_v39 = vld [vmem:[%s2774_s7 + $0x150] sm:$0xf0] }
  0x17   : > { %v2431_v35 = vld [vmem:[%s3123_s1 + $0xe0] sm:$0xff]  ;;  %v2422_v42 = vld [vmem:[%s3123_s1 + $0x98] sm:$0xff]  ;;  %v2481_v45 = vld [vmem:[%s2774_s7 + $0x16c] sm:$0xf0] }
  0x18   : > { %v2114_v36 = vld [vmem:[%s2774_s7 + $0x140] sm:$0xf]  ;;  %v2475_v38 = vld [vmem:[%s2774_s7 + $0x144] sm:$0xf]  ;;  %v2430_v43 = vld [vmem:[%s3123_s1 + $0xd8] sm:$0xff] }
  0x19   : > { %2613 = vmatpush.bf16.msra.mxu2 %v2407_v6  ;;  %907 = vmatpush.bf16.msra.mxu0 %v2407_v6  ;;  %v2115_v40 = vor.u32 %v2477_v37, %v2114_v36  ;;  %v2119_v41 = vor.u32 %v2475_v38, %v2116_v39  ;;  %v2130_v44 = vld [vmem:[%s2774_s7 + $0x160] sm:$0xf]  ;;  %v2479_v46 = vld [vmem:[%s2774_s7 + $0x164] sm:$0xf]  ;;  %v2132_v47 = vld [vmem:[%s2774_s7 + $0x170] sm:$0xf0] }
  0x1a   : > { %2621 = vmatpush.bf16.msra.mxu3 %v2415_v7  ;;  %996 = vmatpush.bf16.msra.mxu1 %v2415_v7  ;;  %v2131_v48 = vor.u32 %v2481_v45, %v2130_v44  ;;  %v2135_v49 = vor.u32 %v2479_v46, %v2132_v47  ;;  %v2421_v50 = vld [vmem:[%s3123_s1 + $0x90] sm:$0xff]  ;;  %v2146_v52 = vld [vmem:[%s2774_s7 + $0x180] sm:$0xf]  ;;  %v2483_v54 = vld [vmem:[%s2774_s7 + $0x184] sm:$0xf] }
  0x1b   : > { %v2429_v51 = vld [vmem:[%s3123_s1 + $0xd0] sm:$0xff]  ;;  %v2420_v58 = vld [vmem:[%s3123_s1 + $0x88] sm:$0xff]  ;;  %v2162_v60 = vld [vmem:[%s2774_s7 + $0x1a0] sm:$0xf] }
  0x1c   : > { %v2485_v53 = vld [vmem:[%s2774_s7 + $0x18c] sm:$0xf0]  ;;  %v2148_v55 = vld [vmem:[%s2774_s7 + $0x190] sm:$0xf0]  ;;  %v2428_v59 = vld [vmem:[%s3123_s1 + $0xc8] sm:$0xff] }
  0x1d   : > { %2614 = vmatpush.bf16.msra.mxu2 %v2406_v8  ;;  %908 = vmatpush.bf16.msra.mxu0 %v2406_v8  ;;  %v2147_v56 = vor.u32 %v2485_v53, %v2146_v52  ;;  %v2151_v57 = vor.u32 %v2483_v54, %v2148_v55  ;;  %v2489_v61 = vld [vmem:[%s2774_s7 + $0x1ac] sm:$0xf0]  ;;  %v2487_v62 = vld [vmem:[%s2774_s7 + $0x1a4] sm:$0xf]  ;;  %v2164_v63 = vld [vmem:[%s2774_s7 + $0x1b0] sm:$0xf0] }
  0x1e   : > { %2622 = vmatpush.bf16.msra.mxu3 %v2414_v9  ;;  %997 = vmatpush.bf16.msra.mxu1 %v2414_v9  ;;  %v2163_v0 = vor.u32 %v2489_v61, %v2162_v60  ;;  %v2167_v1 = vor.u32 %v2487_v62, %v2164_v63  ;;  %v2419_v2 = vld [vmem:[%s3123_s1 + $0x80] sm:$0xff]  ;;  %v2437_v5 = vld [vmem:[%s2774_s7 + $0xc] sm:$0xf0]  ;;  %v1956_v7 = vld [vmem:[%s2774_s7 + $0x10] sm:$0xf0] }
  0x1f   : > { %v2427_v3 = vld [vmem:[%s3123_s1 + $0xc0] sm:$0xff]  ;;  %v2497_v17 = vld [vmem:[%s2774_s7 + $0x1ec] sm:$0xf0]  ;;  %v2196_v19 = vld [vmem:[%s2774_s7 + $0x1f0] sm:$0xf0] }
  0x20   : > { %v1954_v4 = vld [vmem:[%s2774_s7] sm:$0xf]  ;;  %v2435_v6 = vld [vmem:[%s2774_s7 + $0x4] sm:$0xf]  ;;  %v2506_v28 = vld [vmem:[%s3124_s2 + $0x38] sm:$0xff] }
  0x21   : > { %2615 = vmatpush.bf16.msra.mxu2 %v2405_v10  ;;  %909 = vmatpush.bf16.msra.mxu0 %v2405_v10  ;;  %v1955_v8 = vor.u32 %v2437_v5, %v1954_v4  ;;  %v1959_v9 = vor.u32 %v2435_v6, %v1956_v7  ;;  %v2178_v10 = vld [vmem:[%s2774_s7 + $0x1c0] sm:$0xf]  ;;  %v2495_v18 = vld [vmem:[%s2774_s7 + $0x1e4] sm:$0xf]  ;;  %v1962_v29 = vld [vmem:[%s2774_s7 + $0x8] sm:$0xf] }
  0x22   : > { %2623 = vmatpush.bf16.msra.mxu3 %v2413_v11  ;;  %998 = vmatpush.bf16.msra.mxu1 %v2413_v11  ;;  %v2493_v11 = vld [vmem:[%s2774_s7 + $0x1cc] sm:$0xf0]  ;;  %v2194_v16 = vld [vmem:[%s2774_s7 + $0x1e0] sm:$0xf]  ;;  %v2438_v30 = vld [vmem:[%s2774_s7 + $0x14] sm:$0xf0] }
  0x23   : > { %v2436_v31 = vld [vmem:[%s2774_s7 + $0xc] sm:$0xf]  ;;  %v1988_v37 = vld [vmem:[%s2774_s7 + $0x50] sm:$0xf0]  ;;  %v1963_v39 = vor.u32 %v2438_v30, %v1962_v29  ;;  %v1978_v45 = vld [vmem:[%s2774_s7 + $0x28] sm:$0xf] }
  0x24   : > { %v2442_v46 = vld [vmem:[%s2774_s7 + $0x34] sm:$0xf0]  ;;  %v2440_v47 = vld [vmem:[%s2774_s7 + $0x2c] sm:$0xf]  ;;  %v2004_v53 = vld [vmem:[%s2774_s7 + $0x70] sm:$0xf0] }
  0x25   : > { %2616 = vmatpush.bf16.msra.mxu2 %v2404_v12  ;;  %910 = vmatpush.bf16.msra.mxu0 %v2404_v12  ;;  %v2491_v12 = vld [vmem:[%s2774_s7 + $0x1c4] sm:$0xf]  ;;  %v2504_v60 = vld [vmem:[%s3124_s2 + $0x28] sm:$0xff]  ;;  %v2018_v4 = vld [vmem:[%s2774_s7 + $0x80] sm:$0xf] }
  0x26   : > { %2624 = vmatpush.bf16.msra.mxu3 %v2412_v13  ;;  %999 = vmatpush.bf16.msra.mxu1 %v2412_v13  ;;  %v2180_v13 = vld [vmem:[%s2774_s7 + $0x1d0] sm:$0xf0]  ;;  %v2453_v5 = vld [vmem:[%s2774_s7 + $0x8c] sm:$0xf0]  ;;  %v2451_v6 = vld [vmem:[%s2774_s7 + $0x84] sm:$0xf] }
  0x27   : > { %v2019_v7 = vor.u32 %v2453_v5, %v2018_v4  ;;  %v2068_v4 = vld [vmem:[%s2774_s7 + $0xf0] sm:$0xf0] }
  0x29   : > { %2617 = vmatpush.bf16.msra.mxu2 %v2403_v14  ;;  %911 = vmatpush.bf16.msra.mxu0 %v2403_v14  ;;  %v2179_v14 = vor.u32 %v2493_v11, %v2178_v10 }
  0x2a   : > { %2625 = vmatpush.bf16.msra.mxu3 %v2411_v15  ;;  %1000 = vmatpush.bf16.msra.mxu1 %v2411_v15  ;;  %v2183_v15 = vor.u32 %v2491_v12, %v2180_v13 }
  0x2c   : > { %952 = vmatmul.bf16.vlgmr.msra.gmra.mxu2 %v2083_v22  ;;  %912 = vmatmul.bf16.vlgmr.msra.gmra.mxu0 %v1955_v8  ;;  %v2439_v22 = vld [vmem:[%s2774_s7 + $0x24] sm:$0xf]  ;;  %v2020_v8 = vld [vmem:[%s2774_s7 + $0x90] sm:$0xf0] }
  0x2d   : > { %1082 = vmatpush.bf16.msrb.mxu2 %v2426_v20  ;;  %1041 = vmatmul.bf16.vlgmr.msra.gmra.mxu3 %v2087_v23  ;;  %v1970_v20 = vld [vmem:[%s2774_s7 + $0x20] sm:$0xf]  ;;  %v2023_v11 = vor.u32 %v2451_v6, %v2020_v8 }
  0x2e   : > { %1171 = vmatpush.bf16.msrb.mxu3 %v2434_v21  ;;  %1001 = vmatmul.bf16.vlgmr.msra.gmra.mxu1 %v1959_v9  ;;  %v2441_v21 = vld [vmem:[%s2774_s7 + $0x2c] sm:$0xf0] }
  0x2f   : > { %v1971_v23 = vor.u32 %v2441_v21, %v1970_v20  ;;  %1515 = vmatpush.bf16.msrb.mxu0 %v2506_v28  ;;  %v2450_v20 = vld [vmem:[%s2774_s7 + $0x74] sm:$0xf0]  ;;  %v2448_v21 = vld [vmem:[%s2774_s7 + $0x6c] sm:$0xf] }
  0x31   : > { %1083 = vmatpush.bf16.msrb.mxu2 %v2425_v24  ;;  %v1972_v24 = vld [vmem:[%s2774_s7 + $0x30] sm:$0xf0] }
  0x32   : > { %1172 = vmatpush.bf16.msrb.mxu3 %v2433_v25  ;;  %v1975_v25 = vor.u32 %v2439_v22, %v1972_v24  ;;  %v2012_v22 = vld [vmem:[%s2774_s7 + $0x78] sm:$0xf0]  ;;  %v2457_v24 = vld [vmem:[%s2774_s7 + $0xac] sm:$0xf0] }
  0x35   : > { %1084 = vmatpush.bf16.msrb.mxu2 %v2424_v26  ;;  %v2195_v26 = vor.u32 %v2497_v17, %v2194_v16 }
  0x36   : > { %1173 = vmatpush.bf16.msrb.mxu3 %v2432_v27  ;;  %v2199_v27 = vor.u32 %v2495_v18, %v2196_v19  ;;  %v2010_v19 = vld [vmem:[%s2774_s7 + $0x68] sm:$0xf] }
  0x39   : > { %1085 = vmatpush.bf16.msrb.mxu2 %v2423_v34  ;;  %v2445_v34 = vld [vmem:[%s2774_s7 + $0x4c] sm:$0xf0] }
  0x3a   : > { %1174 = vmatpush.bf16.msrb.mxu3 %v2431_v35  ;;  %v2443_v35 = vld [vmem:[%s2774_s7 + $0x44] sm:$0xf] }
  0x3b   : > { %v1991_v38 = vor.u32 %v2443_v35, %v1988_v37 }
  0x3c   : > { %957 = vmatmul.bf16.gmra.mxu2 %v2099_v32  ;;  %917 = vmatmul.bf16.gmra.mxu0 %v1971_v23  ;;  %v1964_v32 = vld [vmem:[%s2774_s7 + $0x18] sm:$0xf0]  ;;  %v2034_v23 = vld [vmem:[%s2774_s7 + $0xa0] sm:$0xf] }
  0x3d   : > { %1046 = vmatmul.bf16.gmra.mxu3 %v2103_v33  ;;  %1086 = vmatpush.bf16.msrb.mxu2 %v2422_v42  ;;  %v1986_v33 = vld [vmem:[%s2774_s7 + $0x40] sm:$0xf] }
  0x3e   : > { %1175 = vmatpush.bf16.msrb.mxu3 %v2430_v43  ;;  %1006 = vmatmul.bf16.gmra.mxu1 %v1975_v25  ;;  %v1987_v36 = vor.u32 %v2445_v34, %v1986_v33  ;;  %v2455_v25 = vld [vmem:[%s2774_s7 + $0xa4] sm:$0xf]  ;;  %v2015_v33 = vor.u32 %v2448_v21, %v2012_v22  ;;  %v2502_v34 = vld [vmem:[%s3124_s2 + $0x18] sm:$0xff] }
  0x41   : > { %1087 = vmatpush.bf16.msrb.mxu2 %v2421_v50  ;;  %v2449_v50 = vld [vmem:[%s2774_s7 + $0x6c] sm:$0xf0] }
  0x42   : > { %1176 = vmatpush.bf16.msrb.mxu3 %v2429_v51  ;;  %v2447_v51 = vld [vmem:[%s2774_s7 + $0x64] sm:$0xf] }
  0x45   : > { %1088 = vmatpush.bf16.msrb.mxu2 %v2420_v58  ;;  %v1979_v58 = vor.u32 %v2442_v46, %v1978_v45  ;;  %v2459_v45 = vld [vmem:[%s2774_s7 + $0xc4] sm:$0xf] }
  0x46   : > { %1177 = vmatpush.bf16.msrb.mxu3 %v2428_v59 }
  0x49   : > { %1089 = vmatpush.bf16.msrb.mxu2 %v2419_v2  ;;  %v2444_v2 = vld [vmem:[%s2774_s7 + $0x4c] sm:$0xf] }
  0x4a   : > { %1178 = vmatpush.bf16.msrb.mxu3 %v2427_v3  ;;  %v1996_v3 = vld [vmem:[%s2774_s7 + $0x58] sm:$0xf0] }
  0x4c   : > { %962 = vmatmul.bf16.gmra.mxu2 %v2115_v40  ;;  %v1967_v40 = vor.u32 %v2436_v31, %v1964_v32  ;;  %922 = vmatmul.bf16.gmra.mxu0 %v1987_v36  ;;  %v2011_v32 = vor.u32 %v2450_v20, %v2010_v19  ;;  %v2460_v19 = vld [vmem:[%s2774_s7 + $0xcc] sm:$0xf]  ;;  %v2060_v20 = vld [vmem:[%s2774_s7 + $0xd8] sm:$0xf0] }
  0x4d   : > { %1051 = vmatmul.bf16.gmra.mxu3 %v2119_v41  ;;  %v2505_v41 = vld [vmem:[%s3124_s2 + $0x30] sm:$0xff] }
  0x4e   : > { %1011 = vmatmul.bf16.gmra.mxu1 %v1991_v38  ;;  %1516 = vmatpush.bf16.msrb.mxu0 %v2505_v41  ;;  %v2026_v38 = vld [vmem:[%s2774_s7 + $0x88] sm:$0xf]  ;;  %v2028_v41 = vld [vmem:[%s2774_s7 + $0x98] sm:$0xf0] }
  0x52   : > { %1517 = vmatpush.bf16.msrb.mxu0 %v2504_v60  ;;  %v2458_v60 = vld [vmem:[%s2774_s7 + $0xb4] sm:$0xf0] }
  0x5c   : > { %967 = vmatmul.bf16.gmra.mxu2 %v2131_v48  ;;  %v1980_v48 = vld [vmem:[%s2774_s7 + $0x38] sm:$0xf0] }
  0x5d   : > { %1056 = vmatmul.bf16.gmra.mxu3 %v2135_v49  ;;  %v2002_v49 = vld [vmem:[%s2774_s7 + $0x60] sm:$0xf]  ;;  %v1983_v59 = vor.u32 %v2440_v47, %v1980_v48  ;;  %v2052_v47 = vld [vmem:[%s2774_s7 + $0xd0] sm:$0xf0] }
  0x5e   : > { %v2003_v52 = vor.u32 %v2449_v50, %v2002_v49  ;;  %v2055_v50 = vor.u32 %v2459_v45, %v2052_v47 }
  0x60   : > { %927 = vmatmul.bf16.gmra.mxu0 %v2003_v52 }
  0x6c   : > { %972 = vmatmul.bf16.gmra.mxu2 %v2147_v56  ;;  %v2007_v56 = vor.u32 %v2447_v51, %v2004_v53 }
  0x6d   : > { %1061 = vmatmul.bf16.gmra.mxu3 %v2151_v57 }
  0x6e   : > { %1016 = vmatmul.bf16.gmra.mxu1 %v2007_v56 }
  0x70   : > { %932 = vmatmul.bf16.gmra.mxu0 %v2019_v7 }
  0x7c   : > { %977 = vmatmul.bf16.gmra.mxu2 %v2163_v0  ;;  %v1994_v0 = vld [vmem:[%s2774_s7 + $0x48] sm:$0xf] }
  0x7d   : > { %1066 = vmatmul.bf16.gmra.mxu3 %v2167_v1  ;;  %v2446_v1 = vld [vmem:[%s2774_s7 + $0x54] sm:$0xf0] }
  0x7e   : > { %v1995_v13 = vor.u32 %v2446_v1, %v1994_v0  ;;  %1021 = vmatmul.bf16.gmra.mxu1 %v2023_v11  ;;  %v2066_v0 = vld [vmem:[%s2774_s7 + $0xe0] sm:$0xf]  ;;  %v2465_v1 = vld [vmem:[%s2774_s7 + $0xec] sm:$0xf0]  ;;  %v2500_v11 = vld [vmem:[%s3124_s2 + $0x8] sm:$0xff] }
  0x8c   : > { %982 = vmatmul.bf16.gmra.mxu2 %v2179_v14  ;;  %v1999_v14 = vor.u32 %v2444_v2, %v1996_v3  ;;  %v2463_v2 = vld [vmem:[%s2774_s7 + $0xe4] sm:$0xf]  ;;  %v2067_v3 = vor.u32 %v2465_v1, %v2066_v0 }
  0x8d   : > { %1071 = vmatmul.bf16.gmra.mxu3 %v2183_v15  ;;  %v2503_v15 = vld [vmem:[%s3124_s2 + $0x20] sm:$0xff]  ;;  %v2071_v7 = vor.u32 %v2463_v2, %v2068_v4  ;;  %v2514_v2 = vld [vmem:[%s3126_s4 + $0x38] sm:$0xff] }
  0x8e   : > { %1518 = vmatpush.bf16.msrb.mxu0 %v2503_v15  ;;  %1716 = vmatpush.bf16.msrb.mxu1 %v2514_v2  ;;  %v2138_v2 = vld [vmem:[%s2774_s7 + $0x168] sm:$0xf] }
  0x92   : > { %1519 = vmatpush.bf16.msrb.mxu0 %v2502_v34  ;;  %v2466_v34 = vld [vmem:[%s2774_s7 + $0xf4] sm:$0xf0] }
  0x9c   : > { %987 = vmatmul.bf16.gmra.mxu2 %v2195_v26  ;;  %v2035_v26 = vor.u32 %v2457_v24, %v2034_v23 }
  0x9d   : > { %1076 = vmatmul.bf16.gmra.mxu3 %v2199_v27  ;;  %v2036_v27 = vld [vmem:[%s2774_s7 + $0xb0] sm:$0xf0] }
  0x9e   : > { %v2039_v30 = vor.u32 %v2455_v25, %v2036_v27  ;;  %937 = vmatmul.bf16.gmra.mxu0 %v2035_v26  ;;  %v2063_v25 = vor.u32 %v2460_v19, %v2060_v20 }
  0xa0   : > { %1026 = vmatmul.bf16.gmra.mxu1 %v2039_v30 }
  0xa9   : > { %v913_v26 = vpop.f32.mrf.mxu0 }
  0xab   : > { %v1002_v27 = vpop.f32.mrf.mxu1 }
  0xac   : > { %1090 = vmatmul.bf16.vlgmr.msrb.gmra.mxu2 %v1963_v39  ;;  %v2454_v39 = vld [vmem:[%s2774_s7 + $0x94] sm:$0xf0] }
  0xad   : > { %1179 = vmatmul.bf16.vlgmr.msrb.gmra.mxu3 %v1967_v40  ;;  %v2452_v40 = vld [vmem:[%s2774_s7 + $0x8c] sm:$0xf]  ;;  %v2027_v52 = vor.u32 %v2454_v39, %v2026_v38 }
  0xae   : > { %v2031_v53 = vor.u32 %v2452_v40, %v2028_v41 }
  0xaf   : > { %v953_v42 = vpop.f32.mrf.mxu2 }
  0xb0   : > { %v1042_v43 = vpop.f32.mrf.mxu3  ;;  %1031 = vmatmul.bf16.gmra.mxu1 %v2055_v50 }
  0xb1   : > { %v2884_v44 = vadd.f32 %v1042_v43, %v953_v42  ;;  %v2050_v42 = vld [vmem:[%s2774_s7 + $0xc0] sm:$0xf]  ;;  %v2461_v43 = vld [vmem:[%s2774_s7 + $0xcc] sm:$0xf0]  ;;  %v915_v38 = vpop.f32.mrf.mxu0 }
  0xb2   : > { %v2051_v46 = vor.u32 %v2461_v43, %v2050_v42 }
  0xb3   : > { %v1004_v39 = vpop.f32.mrf.mxu1 }
  0xb4   : > { %942 = vmatmul.bf16.gmra.mxu0 %v2051_v46 }
  0xb7   : > { %v955_v54 = vpop.f32.mrf.mxu2 }
  0xb8   : > { %v1044_v55 = vpop.f32.mrf.mxu3 }
  0xb9   : > { %v2894_v57 = vadd.f32 %v1044_v55, %v955_v54  ;;  %v2501_v54 = vld [vmem:[%s3124_s2 + $0x10] sm:$0xff] }
  0xba   : > { %1520 = vmatpush.bf16.msrb.mxu0 %v2501_v54  ;;  %v2468_v54 = vld [vmem:[%s2774_s7 + $0x10c] sm:$0xf] }
  0xbb   : > { %v1007_v50 = vpop.f32.mrf.mxu1 }
  0xbc   : > { %1095 = vmatmul.bf16.gmra.mxu2 %v1979_v58 }
  0xbd   : > { %1184 = vmatmul.bf16.gmra.mxu3 %v1983_v59  ;;  %v2042_v59 = vld [vmem:[%s2774_s7 + $0xa8] sm:$0xf] }
  0xbe   : > { %1521 = vmatpush.bf16.msrb.mxu0 %v2500_v11  ;;  %v2472_v11 = vld [vmem:[%s2774_s7 + $0x12c] sm:$0xf] }
  0xbf   : > { %v958_v61 = vpop.f32.mrf.mxu2 }
  0xc0   : > { %v1047_v62 = vpop.f32.mrf.mxu3  ;;  %1036 = vmatmul.bf16.gmra.mxu1 %v2071_v7 }
  0xc1   : > { %v2899_v63 = vadd.f32 %v1047_v62, %v958_v61  ;;  %v2456_v61 = vld [vmem:[%s2774_s7 + $0xac] sm:$0xf]  ;;  %v2044_v62 = vld [vmem:[%s2774_s7 + $0xb8] sm:$0xf0] }
  0xc3   : > { %v1009_v1 = vpop.f32.mrf.mxu1 }
  0xc4   : > { %947 = vmatmul.bf16.gmra.mxu0 %v2067_v3 }
  0xc7   : > { %v960_v9 = vpop.f32.mrf.mxu2 }
  0xc8   : > { %v1049_v10 = vpop.f32.mrf.mxu3 }
  0xc9   : > { %v2909_v12 = vadd.f32 %v1049_v10, %v960_v9  ;;  %v2043_v9 = vor.u32 %v2458_v60, %v2042_v59  ;;  %v2047_v10 = vor.u32 %v2456_v61, %v2044_v62 }
  0xcc   : > { %1100 = vmatmul.bf16.gmra.mxu2 %v1995_v13 }
  0xcd   : > { %1189 = vmatmul.bf16.gmra.mxu3 %v1999_v14 }
  0xcf   : > { %v963_v16 = vpop.f32.mrf.mxu2 }
  0xd0   : > { %v1052_v17 = vpop.f32.mrf.mxu3 }
  0xd1   : > { %v2914_v18 = vadd.f32 %v1052_v17, %v963_v16  ;;  %v2058_v16 = vld [vmem:[%s2774_s7 + $0xc8] sm:$0xf]  ;;  %v2462_v17 = vld [vmem:[%s2774_s7 + $0xd4] sm:$0xf0] }
  0xd2   : > { %v2059_v24 = vor.u32 %v2462_v17, %v2058_v16 }
  0xd7   : > { %v965_v28 = vpop.f32.mrf.mxu2 }
  0xd8   : > { %v1054_v29 = vpop.f32.mrf.mxu3 }
  0xd9   : > { %v2924_v31 = vadd.f32 %v1054_v29, %v965_v28  ;;  %v2499_v28 = vld [vmem:[%s3124_s2] sm:$0xff] }
  0xda   : > { %1522 = vmatpush.bf16.msrb.mxu0 %v2499_v28 }
  0xdc   : > { %1105 = vmatmul.bf16.gmra.mxu2 %v2011_v32 }
  0xdd   : > { %1194 = vmatmul.bf16.gmra.mxu3 %v2015_v33  ;;  %v2074_v33 = vld [vmem:[%s2774_s7 + $0xe8] sm:$0xf] }
  0xde   : > { %v2075_v43 = vor.u32 %v2466_v34, %v2074_v33 }
  0xdf   : > { %v968_v35 = vpop.f32.mrf.mxu2 }
  0xe0   : > { %v1057_v36 = vpop.f32.mrf.mxu3 }
  0xe1   : > { %v2929_v37 = vadd.f32 %v1057_v36, %v968_v35  ;;  %v2464_v35 = vld [vmem:[%s2774_s7 + $0xec] sm:$0xf]  ;;  %v2076_v36 = vld [vmem:[%s2774_s7 + $0xf8] sm:$0xf0] }
  0xe2   : > { %v2079_v45 = vor.u32 %v2464_v35, %v2076_v36  ;;  %v2122_v35 = vld [vmem:[%s2774_s7 + $0x148] sm:$0xf]  ;;  %v2478_v36 = vld [vmem:[%s2774_s7 + $0x154] sm:$0xf0] }
  0xe7   : > { %v970_v48 = vpop.f32.mrf.mxu2 }
  0xe8   : > { %v1059_v49 = vpop.f32.mrf.mxu3 }
  0xe9   : > { %v2939_v51 = vadd.f32 %v1059_v49, %v970_v48  ;;  %v918_v49 = vpop.f32.mrf.mxu0 }
  0xea   : > { %v1008_v34 = vadd.f32 %v1007_v50, %v918_v49  ;;  %v2512_v49 = vld [vmem:[%s3126_s4 + $0x28] sm:$0xff] }
  0xec   : > { %1110 = vmatmul.bf16.gmra.mxu2 %v2027_v52  ;;  %v2090_v52 = vld [vmem:[%s2774_s7 + $0x108] sm:$0xf] }
  0xed   : > { %1199 = vmatmul.bf16.gmra.mxu3 %v2031_v53  ;;  %v2470_v53 = vld [vmem:[%s2774_s7 + $0x114] sm:$0xf0] }
  0xee   : > { %v2091_v61 = vor.u32 %v2470_v53, %v2090_v52 }
  0xef   : > { %v973_v55 = vpop.f32.mrf.mxu2 }
  0xf0   : > { %v1062_v56 = vpop.f32.mrf.mxu3 }
  0xf1   : > { %v2944_v58 = vadd.f32 %v1062_v56, %v973_v55  ;;  %v2092_v55 = vld [vmem:[%s2774_s7 + $0x118] sm:$0xf0]  ;;  %v920_v0 = vpop.f32.mrf.mxu0 }
  0xf2   : > { %v2095_v62 = vor.u32 %v2468_v54, %v2092_v55 }
  0xf7   : > { %v975_v5 = vpop.f32.mrf.mxu2 }
  0xf8   : > { %v1064_v6 = vpop.f32.mrf.mxu3 }
  0xf9   : > { %v2954_v8 = vadd.f32 %v1064_v6, %v975_v5  ;;  %v1003_v5 = vadd.f32 %v1002_v27, %v913_v26  ;;  %v2106_v6 = vld [vmem:[%s2774_s7 + $0x128] sm:$0xf]  ;;  %v923_v7 = vpop.f32.mrf.mxu0  ;;  %v2513_v26 = vld [vmem:[%s3126_s4 + $0x30] sm:$0xff] }
  0xfa   : > { %1717 = vmatpush.bf16.msrb.mxu1 %v2513_v26 }
  0xfc   : > { %1115 = vmatmul.bf16.gmra.mxu2 %v2043_v9  ;;  %v1012_v9 = vpop.f32.mrf.mxu1 }
  0xfd   : > { %1204 = vmatmul.bf16.gmra.mxu3 %v2047_v10  ;;  %v2474_v10 = vld [vmem:[%s2774_s7 + $0x134] sm:$0xf0] }
  0xfe   : > { %1718 = vmatpush.bf16.msrb.mxu1 %v2512_v49 }
  0xff   : > { %v978_v13 = vpop.f32.mrf.mxu2 }
 0x100   : > { %v1067_v14 = vpop.f32.mrf.mxu3 }
 0x101   : > { %v2959_v15 = vadd.f32 %v1067_v14, %v978_v13  ;;  %v2108_v13 = vld [vmem:[%s2774_s7 + $0x138] sm:$0xf0]  ;;  %v1005_v14 = vadd.f32 %v1004_v39, %v915_v38  ;;  %v925_v28 = vpop.f32.mrf.mxu0  ;;  %v2476_v38 = vld [vmem:[%s2774_s7 + $0x14c] sm:$0xf] }
 0x102   : > { %v2124_v39 = vld [vmem:[%s2774_s7 + $0x158] sm:$0xf0] }
 0x103   : > { %v2127_v52 = vor.u32 %v2476_v38, %v2124_v39 }
 0x107   : > { %v980_v21 = vpop.f32.mrf.mxu2 }
 0x108   : > { %v1069_v22 = vpop.f32.mrf.mxu3 }
 0x109   : > { %v2965_v23 = vadd.f32 %v1069_v22, %v980_v21  ;;  %v2107_v21 = vor.u32 %v2474_v10, %v2106_v6  ;;  %v2111_v22 = vor.u32 %v2472_v11, %v2108_v13  ;;  %v928_v53 = vpop.f32.mrf.mxu0 }
 0x10c   : > { %1120 = vmatmul.bf16.gmra.mxu2 %v2059_v24 }
 0x10d   : > { %1209 = vmatmul.bf16.gmra.mxu3 %v2063_v25 }
 0x10f   : > { %v983_v29 = vpop.f32.mrf.mxu2 }
 0x110   : > { %v1072_v30 = vpop.f32.mrf.mxu3 }
 0x111   : > { %v2970_v32 = vadd.f32 %v1072_v30, %v983_v29  ;;  %v1014_v29 = vpop.f32.mrf.mxu1 }
 0x112   : > { %v1015_v6 = vadd.f32 %v1014_v29, %v925_v28  ;;  %v2486_v28 = vld [vmem:[%s2774_s7 + $0x194] sm:$0xf0]  ;;  %v2484_v29 = vld [vmem:[%s2774_s7 + $0x18c] sm:$0xf] }
 0x117   : > { %v985_v40 = vpop.f32.mrf.mxu2 }
 0x118   : > { %v1074_v41 = vpop.f32.mrf.mxu3 }
 0x119   : > { %v2976_v42 = vadd.f32 %v1074_v41, %v985_v40  ;;  %v1010_v40 = vadd.f32 %v1009_v1, %v920_v0  ;;  %v1017_v54 = vpop.f32.mrf.mxu1  ;;  %v930_v0 = vpop.f32.mrf.mxu0 }
 0x11a   : > { %v1018_v26 = vadd.f32 %v1017_v54, %v928_v53 }
 0x11c   : > { %1125 = vmatmul.bf16.gmra.mxu2 %v2075_v43 }
 0x11d   : > { %1214 = vmatmul.bf16.gmra.mxu3 %v2079_v45 }
 0x11f   : > { %v988_v46 = vpop.f32.mrf.mxu2 }
 0x120   : > { %v1077_v47 = vpop.f32.mrf.mxu3 }
 0x121   : > { %v2978_v48 = vadd.f32 %v1077_v47, %v988_v46  ;;  %v2123_v47 = vor.u32 %v2478_v36, %v2122_v35  ;;  %v1019_v1 = vpop.f32.mrf.mxu1 }
 0x127   : > { %v990_v56 = vpop.f32.mrf.mxu2 }
 0x128   : > { %v1079_v59 = vpop.f32.mrf.mxu3 }
 0x129   : > { %v2984_v60 = vadd.f32 %v1079_v59, %v990_v56 }
 0x12c   : > { %1130 = vmatmul.bf16.gmra.mxu2 %v2091_v61 }
 0x12d   : > { %1219 = vmatmul.bf16.gmra.mxu3 %v2095_v62  ;;  %v1013_v62 = vadd.f32 %v1012_v9, %v923_v7  ;;  %v933_v9 = vpop.f32.mrf.mxu0 }
 0x12f   : > { %v1091_v3 = vpop.f32.mrf.mxu2 }
 0x130   : > { %v1180_v4 = vpop.f32.mrf.mxu3  ;;  %v1092_v16 = vadd.f32 %v1091_v3, %v1003_v5  ;;  %v2482_v3 = vld [vmem:[%s2774_s7 + $0x174] sm:$0xf0]  ;;  %v2140_v5 = vld [vmem:[%s2774_s7 + $0x178] sm:$0xf0] }
 0x132   : > { %v1181_v24 = vadd.f32 %v1180_v4, %v1092_v16  ;;  %v2480_v4 = vld [vmem:[%s2774_s7 + $0x16c] sm:$0xf]  ;;  %v2139_v16 = vor.u32 %v2482_v3, %v2138_v2 }
 0x135   : > { %v935_v35 = vpop.f32.mrf.mxu0 }
 0x137   : > { %v1093_v17 = vpop.f32.mrf.mxu2 }
 0x138   : > { %v1182_v19 = vpop.f32.mrf.mxu3  ;;  %v1094_v20 = vadd.f32 %v1093_v17, %v1005_v14  ;;  %v2143_v17 = vor.u32 %v2480_v4, %v2140_v5 }
 0x13a   : > { %v1183_v25 = vadd.f32 %v1182_v19, %v1094_v20 }
 0x13c   : > { %v1431_v27 = vpack.c.bf16 %v1183_v25, %v1181_v24  ;;  %1135 = vmatmul.bf16.gmra.mxu2 %v2107_v21  ;;  %v1022_v21 = vpop.f32.mrf.mxu1 }
 0x13d   : > { %1224 = vmatmul.bf16.gmra.mxu3 %v2111_v22  ;;  %v2511_v22 = vld [vmem:[%s3126_s4 + $0x20] sm:$0xff]  ;;  %v1023_v49 = vadd.f32 %v1022_v21, %v933_v9 }
 0x13e   : > { %1523 = vmatmul.bf16.vlgmr.msrb.gmra.mxu0 %v1431_v27  ;;  %1719 = vmatpush.bf16.msrb.mxu1 %v2511_v22  ;;  %v2154_v27 = vld [vmem:[%s2774_s7 + $0x188] sm:$0xf] }
 0x13f   : > { %v1096_v30 = vpop.f32.mrf.mxu2  ;;  %v2186_v22 = vld [vmem:[%s2774_s7 + $0x1c8] sm:$0xf] }
 0x140   : > { %v1185_v33 = vpop.f32.mrf.mxu3  ;;  %v1097_v41 = vadd.f32 %v1096_v30, %v1008_v34  ;;  %v2156_v30 = vld [vmem:[%s2774_s7 + $0x198] sm:$0xf0] }
 0x142   : > { %v1186_v55 = vadd.f32 %v1185_v33, %v1097_v41  ;;  %v1020_v33 = vadd.f32 %v1019_v1, %v930_v0  ;;  %v2155_v41 = vor.u32 %v2486_v28, %v2154_v27 }
 0x144   : > { %v1024_v36 = vpop.f32.mrf.mxu1 }
 0x145   : > { %v1025_v0 = vadd.f32 %v1024_v36, %v935_v35 }
 0x147   : > { %v1098_v43 = vpop.f32.mrf.mxu2 }
 0x148   : > { %v1187_v45 = vpop.f32.mrf.mxu3  ;;  %v1099_v46 = vadd.f32 %v1098_v43, %v1010_v40  ;;  %v2159_v43 = vor.u32 %v2484_v29, %v2156_v30 }
 0x14a   : > { %v1188_v56 = vadd.f32 %v1187_v45, %v1099_v46 }
 0x14c   : > { %1140 = vmatmul.bf16.gmra.mxu2 %v2123_v47  ;;  %v1432_v50 = vpack.c.bf16 %v1188_v56, %v1186_v55  ;;  %v938_v55 = vpop.f32.mrf.mxu0  ;;  %v1027_v56 = vpop.f32.mrf.mxu1 }
 0x14d   : > { %1229 = vmatmul.bf16.gmra.mxu3 %v2127_v52  ;;  %v2510_v52 = vld [vmem:[%s3126_s4 + $0x18] sm:$0xff] }
 0x14e   : > { %1528 = vmatmul.bf16.gmra.mxu0 %v1432_v50  ;;  %1720 = vmatpush.bf16.msrb.mxu1 %v2510_v52  ;;  %v2170_v50 = vld [vmem:[%s2774_s7 + $0x1a8] sm:$0xf] }
 0x14f   : > { %v1101_v59 = vpop.f32.mrf.mxu2  ;;  %v2202_v52 = vld [vmem:[%s2774_s7 + $0x1e8] sm:$0xf] }
 0x150   : > { %v1190_v61 = vpop.f32.mrf.mxu3  ;;  %v1102_v10 = vadd.f32 %v1101_v59, %v1013_v62  ;;  %v2490_v59 = vld [vmem:[%s2774_s7 + $0x1b4] sm:$0xf0]  ;;  %v2172_v62 = vld [vmem:[%s2774_s7 + $0x1b8] sm:$0xf0] }
 0x151   : > { %v2171_v5 = vor.u32 %v2490_v59, %v2170_v50 }
 0x152   : > { %v1191_v19 = vadd.f32 %v1190_v61, %v1102_v10  ;;  %v2488_v61 = vld [vmem:[%s2774_s7 + $0x1ac] sm:$0xf] }
 0x157   : > { %v1103_v11 = vpop.f32.mrf.mxu2 }
 0x158   : > { %v1192_v13 = vpop.f32.mrf.mxu3  ;;  %v1104_v14 = vadd.f32 %v1103_v11, %v1015_v6  ;;  %v2175_v6 = vor.u32 %v2488_v61, %v2172_v62 }
 0x15a   : > { %v1193_v20 = vadd.f32 %v1192_v13, %v1104_v14  ;;  %v940_v13 = vpop.f32.mrf.mxu0  ;;  %v1029_v14 = vpop.f32.mrf.mxu1 }
 0x15b   : > { %v1030_v27 = vadd.f32 %v1029_v14, %v940_v13 }
 0x15c   : > { %1145 = vmatmul.bf16.gmra.mxu2 %v2139_v16  ;;  %v1433_v7 = vpack.c.bf16 %v1193_v20, %v1191_v19 }
 0x15d   : > { %1234 = vmatmul.bf16.gmra.mxu3 %v2143_v17  ;;  %v2509_v17 = vld [vmem:[%s3126_s4 + $0x10] sm:$0xff] }
 0x15e   : > { %1533 = vmatmul.bf16.gmra.mxu0 %v1433_v7  ;;  %1721 = vmatpush.bf16.msrb.mxu1 %v2509_v17  ;;  %v1028_v7 = vadd.f32 %v1027_v56, %v938_v55  ;;  %v2204_v55 = vld [vmem:[%s2774_s7 + $0x1f8] sm:$0xf0] }
 0x15f   : > { %v1106_v24 = vpop.f32.mrf.mxu2 }
 0x160   : > { %v1195_v25 = vpop.f32.mrf.mxu3  ;;  %v1107_v34 = vadd.f32 %v1106_v24, %v1018_v26  ;;  %v2494_v24 = vld [vmem:[%s2774_s7 + $0x1d4] sm:$0xf0]  ;;  %v2188_v26 = vld [vmem:[%s2774_s7 + $0x1d8] sm:$0xf0] }
 0x162   : > { %v1196_v45 = vadd.f32 %v1195_v25, %v1107_v34  ;;  %v943_v9 = vpop.f32.mrf.mxu0  ;;  %v1032_v21 = vpop.f32.mrf.mxu1  ;;  %v2492_v25 = vld [vmem:[%s2774_s7 + $0x1cc] sm:$0xf]  ;;  %v2187_v34 = vor.u32 %v2494_v24, %v2186_v22 }
 0x163   : > { %v2191_v35 = vor.u32 %v2492_v25, %v2188_v26 }
 0x167   : > { %v1108_v38 = vpop.f32.mrf.mxu2 }
 0x168   : > { %v1197_v39 = vpop.f32.mrf.mxu3  ;;  %v1109_v40 = vadd.f32 %v1108_v38, %v1020_v33 }
 0x16a   : > { %v1198_v46 = vadd.f32 %v1197_v39, %v1109_v40  ;;  %v2508_v40 = vld [vmem:[%s3126_s4 + $0x8] sm:$0xff] }
 0x16b   : > { %1722 = vmatpush.bf16.msrb.mxu1 %v2508_v40 }
 0x16c   : > { %1150 = vmatmul.bf16.gmra.mxu2 %v2155_v41  ;;  %v1434_v47 = vpack.c.bf16 %v1198_v46, %v1196_v45  ;;  %v945_v41 = vpop.f32.mrf.mxu0 }
 0x16d   : > { %1239 = vmatmul.bf16.gmra.mxu3 %v2159_v43  ;;  %v1034_v43 = vpop.f32.mrf.mxu1 }
 0x16e   : > { %1538 = vmatmul.bf16.gmra.mxu0 %v1434_v47  ;;  %v1033_v47 = vadd.f32 %v1032_v21, %v943_v9  ;;  %v1035_v56 = vadd.f32 %v1034_v43, %v945_v41 }
 0x16f   : > { %v1111_v53 = vpop.f32.mrf.mxu2 }
 0x170   : > { %v1200_v54 = vpop.f32.mrf.mxu3  ;;  %v1112_v1 = vadd.f32 %v1111_v53, %v1023_v49  ;;  %v2498_v53 = vld [vmem:[%s2774_s7 + $0x1f4] sm:$0xf0] }
 0x171   : > { %v2203_v62 = vor.u32 %v2498_v53, %v2202_v52 }
 0x172   : > { %v1201_v10 = vadd.f32 %v1200_v54, %v1112_v1  ;;  %v2496_v54 = vld [vmem:[%s2774_s7 + $0x1ec] sm:$0xf] }
 0x174   : > { %v948_v1 = vpop.f32.mrf.mxu0 }
 0x177   : > { %v1113_v2 = vpop.f32.mrf.mxu2 }
 0x178   : > { %v1202_v3 = vpop.f32.mrf.mxu3  ;;  %v1114_v4 = vadd.f32 %v1113_v2, %v1025_v0  ;;  %v2207_v0 = vor.u32 %v2496_v54, %v2204_v55  ;;  %v1037_v2 = vpop.f32.mrf.mxu1 }
 0x179   : > { %v1038_v13 = vadd.f32 %v1037_v2, %v948_v1 }
 0x17a   : > { %v1203_v11 = vadd.f32 %v1202_v3, %v1114_v4 }
 0x17c   : > { %v1435_v16 = vpack.c.bf16 %v1203_v11, %v1201_v10  ;;  %1155 = vmatmul.bf16.gmra.mxu2 %v2171_v5  ;;  %v950_v14 = vpop.f32.mrf.mxu0 }
 0x17d   : > { %1244 = vmatmul.bf16.gmra.mxu3 %v2175_v6  ;;  %v2507_v6 = vld [vmem:[%s3126_s4] sm:$0xff] }
 0x17e   : > { %1543 = vmatmul.bf16.gmra.mxu0 %v1435_v16  ;;  %1723 = vmatpush.bf16.msrb.mxu1 %v2507_v6 }
 0x17f   : > { %v1116_v19 = vpop.f32.mrf.mxu2 }
 0x180   : > { %v1205_v20 = vpop.f32.mrf.mxu3  ;;  %v1117_v28 = vadd.f32 %v1116_v19, %v1028_v7  ;;  %v1039_v16 = vpop.f32.mrf.mxu1 }
 0x181   : > { %v1040_v17 = vadd.f32 %v1039_v16, %v950_v14 }
 0x182   : > { %v1206_v36 = vadd.f32 %v1205_v20, %v1117_v28 }
 0x187   : > { %v1118_v29 = vpop.f32.mrf.mxu2 }
 0x188   : > { %v1207_v30 = vpop.f32.mrf.mxu3  ;;  %v1119_v33 = vadd.f32 %v1118_v29, %v1030_v27 }
 0x18a   : > { %v1208_v38 = vadd.f32 %v1207_v30, %v1119_v33 }
 0x18c   : > { %v1436_v39 = vpack.c.bf16 %v1208_v38, %v1206_v36  ;;  %1160 = vmatmul.bf16.gmra.mxu2 %v2187_v34  ;;  %v3043_v38 = vld [vmem:[%s3125_s3] ss:$0 sm:$0xff] }
 0x18d   : > { %1249 = vmatmul.bf16.gmra.mxu3 %v2191_v35 }
 0x18e   : > { %1548 = vmatmul.bf16.gmra.mxu0 %v1436_v39 }
 0x18f   : > { %v1121_v45 = vpop.f32.mrf.mxu2 }
 0x190   : > { %v1210_v46 = vpop.f32.mrf.mxu3  ;;  %v1122_v49 = vadd.f32 %v1121_v45, %v1033_v47 }
 0x192   : > { %v1211_v3 = vadd.f32 %v1210_v46, %v1122_v49 }
 0x197   : > { %v1123_v50 = vpop.f32.mrf.mxu2 }
 0x198   : > { %v1212_v59 = vpop.f32.mrf.mxu3  ;;  %v1124_v61 = vadd.f32 %v1123_v50, %v1035_v56 }
 0x19a   : > { %v1213_v4 = vadd.f32 %v1212_v59, %v1124_v61 }
 0x19c   : > { %v1437_v5 = vpack.c.bf16 %v1213_v4, %v1211_v3  ;;  %1165 = vmatmul.bf16.gmra.mxu2 %v2203_v62 }
 0x19d   : > { %1254 = vmatmul.bf16.gmra.mxu3 %v2207_v0 }
 0x19e   : > { %1553 = vmatmul.bf16.gmra.mxu0 %v1437_v5 }
 0x19f   : > { %v1126_v10 = vpop.f32.mrf.mxu2 }
 0x1a0   : > { %v1215_v11 = vpop.f32.mrf.mxu3  ;;  %v1127_v19 = vadd.f32 %v1126_v10, %v1038_v13 }
 0x1a2   : > { %v1216_v21 = vadd.f32 %v1215_v11, %v1127_v19 }
 0x1a7   : > { %v1128_v20 = vpop.f32.mrf.mxu2 }
 0x1a8   : > { %v1217_v7 = vpop.f32.mrf.mxu3  ;;  %v1129_v9 = vadd.f32 %v1128_v20, %v1040_v17 }
 0x1aa   : > { %v1218_v22 = vadd.f32 %v1217_v7, %v1129_v9 }
 0x1ac   : > { %v1438_v24 = vpack.c.bf16 %v1218_v22, %v1216_v21 }
 0x1ae   : > { %1558 = vmatmul.bf16.gmra.mxu0 %v1438_v24 }
 0x1af   : > { %v1131_v25 = vpop.f32.mrf.mxu2 }
 0x1b0   : > { %v1220_v26 = vpop.f32.mrf.mxu3  ;;  %v1132_v27 = vadd.f32 %v1131_v25, %v2884_v44 }
 0x1b2   : > { %v1221_v33 = vadd.f32 %v1220_v26, %v1132_v27 }
 0x1b7   : > { %v1133_v28 = vpop.f32.mrf.mxu2 }
 0x1b8   : > { %v1222_v29 = vpop.f32.mrf.mxu3  ;;  %v1134_v30 = vadd.f32 %v1133_v28, %v2894_v57 }
 0x1ba   : > { %v1223_v34 = vadd.f32 %v1222_v29, %v1134_v30 }
 0x1bb   : > { %v1524_v35 = vpop.f32.mrf.mxu0 }
 0x1bc   : > { %v1439_v36 = vpack.c.bf16 %v1223_v34, %v1221_v33  ;;  %v1525_v41 = vadd.f32 %v3043_v38, %v1524_v35 }
 0x1be   : > { %1563 = vmatmul.bf16.gmra.mxu0 %v1439_v36  ;;  %v1604_v45 = vmax.f32 %v1525_v41, 0.0 }
 0x1bf   : > { %v1136_v39 = vpop.f32.mrf.mxu2 }
 0x1c0   : > { %v1225_v40 = vpop.f32.mrf.mxu3  ;;  %v1137_v57 = vadd.f32 %v1136_v39, %v2899_v63 }
 0x1c2   : > { %v1226_v55 = vadd.f32 %v1225_v40, %v1137_v57 }
 0x1c3   : > { %v1526_v43 = vpop.f32.mrf.mxu0 }
 0x1c4   : > { %v1527_v44 = vadd.f32 %v3043_v38, %v1526_v43 }
 0x1c6   : > { %v1605_v46 = vmax.f32 %v1527_v44, 0.0 }
 0x1c7   : > { %v1138_v47 = vpop.f32.mrf.mxu2 }
 0x1c8   : > { %v1227_v52 = vpop.f32.mrf.mxu3  ;;  %v1139_v53 = vadd.f32 %v1138_v47, %v2909_v12  ;;  %v1636_v54 = vpack.c.bf16 %v1605_v46, %v1604_v45 }
 0x1ca   : > { %v1228_v56 = vadd.f32 %v1227_v52, %v1139_v53  ;;  %1724 = vmatmul.bf16.vlgmr.msrb.gmra.mxu1 %v1636_v54 }
 0x1cb   : > { %v1529_v49 = vpop.f32.mrf.mxu0 }
 0x1cc   : > { %v1440_v50 = vpack.c.bf16 %v1228_v56, %v1226_v55  ;;  %v1530_v62 = vadd.f32 %v3043_v38, %v1529_v49 }
 0x1ce   : > { %1568 = vmatmul.bf16.gmra.mxu0 %v1440_v50  ;;  %v1606_v63 = vmax.f32 %v1530_v62, 0.0 }
 0x1cf   : > { %v1141_v59 = vpop.f32.mrf.mxu2 }
 0x1d0   : > { %v1230_v61 = vpop.f32.mrf.mxu3  ;;  %v1142_v2 = vadd.f32 %v1141_v59, %v2914_v18 }
 0x1d2   : > { %v1231_v10 = vadd.f32 %v1230_v61, %v1142_v2 }
 0x1d3   : > { %v1531_v0 = vpop.f32.mrf.mxu0 }
 0x1d4   : > { %v1532_v1 = vadd.f32 %v3043_v38, %v1531_v0 }
 0x1d6   : > { %v1607_v3 = vmax.f32 %v1532_v1, 0.0 }
 0x1d7   : > { %v1143_v4 = vpop.f32.mrf.mxu2 }
 0x1d8   : > { %v1232_v12 = vpop.f32.mrf.mxu3  ;;  %v1144_v5 = vadd.f32 %v1143_v4, %v2924_v31  ;;  %v1637_v6 = vpack.c.bf16 %v1607_v3, %v1606_v63 }
 0x1da   : > { %v1233_v11 = vadd.f32 %v1232_v12, %v1144_v5  ;;  %1729 = vmatmul.bf16.gmra.mxu1 %v1637_v6 }
 0x1db   : > { %v1534_v13 = vpop.f32.mrf.mxu0 }
 0x1dc   : > { %v1441_v14 = vpack.c.bf16 %v1233_v11, %v1231_v10  ;;  %v1535_v19 = vadd.f32 %v3043_v38, %v1534_v13 }
 0x1de   : > { %1573 = vmatmul.bf16.gmra.mxu0 %v1441_v14  ;;  %v1608_v18 = vmax.f32 %v1535_v19, 0.0 }
 0x1df   : > { %v1146_v16 = vpop.f32.mrf.mxu2 }
 0x1e0   : > { %v1235_v17 = vpop.f32.mrf.mxu3  ;;  %v1147_v9 = vadd.f32 %v1146_v16, %v2929_v37 }
 0x1e2   : > { %v1236_v26 = vadd.f32 %v1235_v17, %v1147_v9 }
 0x1e3   : > { %v1536_v20 = vpop.f32.mrf.mxu0 }
 0x1e4   : > { %v1537_v7 = vadd.f32 %v3043_v38, %v1536_v20 }
 0x1e6   : > { %v1609_v21 = vmax.f32 %v1537_v7, 0.0 }
 0x1e7   : > { %v1148_v22 = vpop.f32.mrf.mxu2 }
 0x1e8   : > { %v1237_v31 = vpop.f32.mrf.mxu3  ;;  %v1149_v24 = vadd.f32 %v1148_v22, %v2939_v51  ;;  %v1638_v25 = vpack.c.bf16 %v1609_v21, %v1608_v18 }
 0x1ea   : > { %v1238_v27 = vadd.f32 %v1237_v31, %v1149_v24  ;;  %1734 = vmatmul.bf16.gmra.mxu1 %v1638_v25 }
 0x1eb   : > { %v1539_v28 = vpop.f32.mrf.mxu0 }
 0x1ec   : > { %v1442_v29 = vpack.c.bf16 %v1238_v27, %v1236_v26  ;;  %v1540_v34 = vadd.f32 %v3043_v38, %v1539_v28 }
 0x1ee   : > { %1578 = vmatmul.bf16.gmra.mxu0 %v1442_v29  ;;  %v1610_v37 = vmax.f32 %v1540_v34, 0.0 }
 0x1ef   : > { %v1151_v30 = vpop.f32.mrf.mxu2 }
 0x1f0   : > { %v1240_v33 = vpop.f32.mrf.mxu3  ;;  %v1152_v39 = vadd.f32 %v1151_v30, %v2944_v58 }
 0x1f2   : > { %v1241_v45 = vadd.f32 %v1240_v33, %v1152_v39 }
 0x1f3   : > { %v1541_v35 = vpop.f32.mrf.mxu0 }
 0x1f4   : > { %v1542_v36 = vadd.f32 %v3043_v38, %v1541_v35 }
 0x1f6   : > { %v1611_v40 = vmax.f32 %v1542_v36, 0.0 }
 0x1f7   : > { %v1153_v41 = vpop.f32.mrf.mxu2 }
 0x1f8   : > { %v1242_v51 = vpop.f32.mrf.mxu3  ;;  %v1154_v43 = vadd.f32 %v1153_v41, %v2954_v8  ;;  %v1639_v44 = vpack.c.bf16 %v1611_v40, %v1610_v37 }
 0x1fa   : > { %v1243_v57 = vadd.f32 %v1242_v51, %v1154_v43  ;;  %1739 = vmatmul.bf16.gmra.mxu1 %v1639_v44 }
 0x1fb   : > { %v1544_v46 = vpop.f32.mrf.mxu0 }
 0x1fc   : > { %v1443_v47 = vpack.c.bf16 %v1243_v57, %v1241_v45  ;;  %v1545_v54 = vadd.f32 %v3043_v38, %v1544_v46 }
 0x1fe   : > { %1583 = vmatmul.bf16.gmra.mxu0 %v1443_v47  ;;  %v1612_v58 = vmax.f32 %v1545_v54, 0.0 }
 0x1ff   : > { %v1156_v52 = vpop.f32.mrf.mxu2 }
 0x200   : > { %v1245_v53 = vpop.f32.mrf.mxu3  ;;  %v1157_v49 = vadd.f32 %v1156_v52, %v2959_v15 }
 0x202   : > { %v1246_v0 = vadd.f32 %v1245_v53, %v1157_v49 }
 0x203   : > { %v1546_v55 = vpop.f32.mrf.mxu0 }
 0x204   : > { %v1547_v56 = vadd.f32 %v3043_v38, %v1546_v55 }
 0x206   : > { %v1613_v50 = vmax.f32 %v1547_v56, 0.0 }
 0x207   : > { %v1158_v59 = vpop.f32.mrf.mxu2 }
 0x208   : > { %v1247_v8 = vpop.f32.mrf.mxu3  ;;  %v1640_v61 = vpack.c.bf16 %v1613_v50, %v1612_v58  ;;  %v1159_v62 = vadd.f32 %v1158_v59, %v2965_v23 }
 0x20a   : > { %v1248_v1 = vadd.f32 %v1247_v8, %v1159_v62  ;;  %1744 = vmatmul.bf16.gmra.mxu1 %v1640_v61 }
 0x20b   : > { %v1549_v63 = vpop.f32.mrf.mxu0 }
 0x20c   : > { %v1444_v2 = vpack.c.bf16 %v1248_v1, %v1246_v0  ;;  %v1550_v12 = vadd.f32 %v3043_v38, %v1549_v63 }
 0x20e   : > { %1588 = vmatmul.bf16.gmra.mxu0 %v1444_v2  ;;  %v1614_v15 = vmax.f32 %v1550_v12, 0.0 }
 0x20f   : > { %v1161_v3 = vpop.f32.mrf.mxu2 }
 0x210   : > { %v1250_v4 = vpop.f32.mrf.mxu3  ;;  %v1162_v10 = vadd.f32 %v1161_v3, %v2970_v32 }
 0x212   : > { %v1251_v17 = vadd.f32 %v1250_v4, %v1162_v10 }
 0x213   : > { %v1551_v5 = vpop.f32.mrf.mxu0 }
 0x214   : > { %v1552_v6 = vadd.f32 %v3043_v38, %v1551_v5 }
 0x216   : > { %v1615_v11 = vmax.f32 %v1552_v6, 0.0 }
 0x217   : > { %v1163_v13 = vpop.f32.mrf.mxu2 }
 0x218   : > { %v1252_v14 = vpop.f32.mrf.mxu3  ;;  %v1641_v23 = vpack.c.bf16 %v1615_v11, %v1614_v15  ;;  %v1164_v16 = vadd.f32 %v1163_v13, %v2976_v42 }
 0x21a   : > { %v1253_v19 = vadd.f32 %v1252_v14, %v1164_v16  ;;  %1749 = vmatmul.bf16.gmra.mxu1 %v1641_v23 }
 0x21b   : > { %v1554_v20 = vpop.f32.mrf.mxu0 }
 0x21c   : > { %v1445_v7 = vpack.c.bf16 %v1253_v19, %v1251_v17  ;;  %v1555_v21 = vadd.f32 %v3043_v38, %v1554_v20 }
 0x21e   : > { %1593 = vmatmul.bf16.gmra.mxu0 %v1445_v7  ;;  %v1616_v32 = vmax.f32 %v1555_v21, 0.0 }
 0x21f   : > { %v1166_v18 = vpop.f32.mrf.mxu2 }
 0x220   : > { %v1255_v9 = vpop.f32.mrf.mxu3  ;;  %v1167_v24 = vadd.f32 %v1166_v18, %v2978_v48 }
 0x222   : > { %v1256_v29 = vadd.f32 %v1255_v9, %v1167_v24 }
 0x223   : > { %v1556_v22 = vpop.f32.mrf.mxu0 }
 0x224   : > { %v1557_v31 = vadd.f32 %v3043_v38, %v1556_v22 }
 0x226   : > { %v1617_v25 = vmax.f32 %v1557_v31, 0.0 }
 0x227   : > { %v1168_v26 = vpop.f32.mrf.mxu2 }
 0x228   : > { %v1642_v27 = vpack.c.bf16 %v1617_v25, %v1616_v32  ;;  %v1169_v42 = vadd.f32 %v1168_v26, %v2984_v60  ;;  %v1257_v28 = vpop.f32.mrf.mxu3 }
 0x22a   : > { %v1258_v30 = vadd.f32 %v1257_v28, %v1169_v42  ;;  %1754 = vmatmul.bf16.gmra.mxu1 %v1642_v27 }
 0x22b   : > { %v1559_v33 = vpop.f32.mrf.mxu0 }
 0x22c   : > { %v1446_v34 = vpack.c.bf16 %v1258_v30, %v1256_v29  ;;  %v1560_v35 = vadd.f32 %v3043_v38, %v1559_v33 }
 0x22e   : > { %1598 = vmatmul.bf16.gmra.mxu0 %v1446_v34  ;;  %v1618_v39 = vmax.f32 %v1560_v35, 0.0 }
 0x233   : > { %v1561_v36 = vpop.f32.mrf.mxu0 }
 0x234   : > { %v1562_v37 = vadd.f32 %v3043_v38, %v1561_v36 }
 0x236   : > { %v1619_v48 = vmax.f32 %v1562_v37, 0.0 }
 0x238   : > { %v1643_v40 = vpack.c.bf16 %v1619_v48, %v1618_v39 }
 0x23a   : > { %1759 = vmatmul.bf16.gmra.mxu1 %v1643_v40 }
 0x23b   : > { %v1564_v41 = vpop.f32.mrf.mxu0 }
 0x23c   : > { %v1565_v60 = vadd.f32 %v3043_v38, %v1564_v41 }
 0x23e   : > { %v1620_v44 = vmax.f32 %v1565_v60, 0.0 }
 0x243   : > { %v1566_v51 = vpop.f32.mrf.mxu0 }
 0x244   : > { %v1567_v43 = vadd.f32 %v3043_v38, %v1566_v51 }
 0x246   : > { %v1621_v45 = vmax.f32 %v1567_v43, 0.0 }
 0x247   : > { %v1725_v57 = vpop.f32.mrf.mxu1 }
 0x248   : > { %v1644_v46 = vpack.c.bf16 %v1621_v45, %v1620_v44 }
 0x24a   : > { %1764 = vmatmul.bf16.gmra.mxu1 %v1644_v46 }
 0x24b   : > { %v1569_v47 = vpop.f32.mrf.mxu0 }
 0x24c   : > { %v1570_v54 = vadd.f32 %v3043_v38, %v1569_v47 }
 0x24e   : > { %v1622_v58 = vmax.f32 %v1570_v54, 0.0 }
 0x24f   : > { %v1727_v52 = vpop.f32.mrf.mxu1 }
 0x250   : > { %v2518_v53 = vpack.c.bf16 %v1727_v52, %v1725_v57 }
 0x252   : > { %2519 = vst [vmem:[%s3081_s24] sm:$0xff] %v2518_v53  }
 0x253   : > { %v1571_v55 = vpop.f32.mrf.mxu0 }
 0x254   : > { %v1572_v56 = vadd.f32 %v3043_v38, %v1571_v55 }
 0x256   : > { %v1623_v49 = vmax.f32 %v1572_v56, 0.0 }
 0x257   : > { %v1730_v50 = vpop.f32.mrf.mxu1 }
 0x258   : > { %v1645_v59 = vpack.c.bf16 %v1623_v49, %v1622_v58 }
 0x25a   : > { %1769 = vmatmul.bf16.gmra.mxu1 %v1645_v59 }
 0x25b   : > { %v1574_v8 = vpop.f32.mrf.mxu0 }
 0x25c   : > { %v1575_v0 = vadd.f32 %v3043_v38, %v1574_v8 }
 0x25e   : > { %v1624_v2 = vmax.f32 %v1575_v0, 0.0 }
 0x25f   : > { %v1732_v61 = vpop.f32.mrf.mxu1 }
 0x260   : > { %v2523_v62 = vpack.c.bf16 %v1732_v61, %v1730_v50 }
 0x262   : > { %2595 = vst [vmem:[%s3081_s24 + $0x8] sm:$0xff] %v2523_v62  }
 0x263   : > { %v1576_v1 = vpop.f32.mrf.mxu0 }
 0x264   : > { %v1577_v63 = vadd.f32 %v3043_v38, %v1576_v1 }
 0x266   : > { %v1625_v3 = vmax.f32 %v1577_v63, 0.0 }
 0x267   : > { %v1735_v4 = vpop.f32.mrf.mxu1 }
 0x268   : > { %v1646_v12 = vpack.c.bf16 %v1625_v3, %v1624_v2 }
 0x26a   : > { %1774 = vmatmul.bf16.gmra.mxu1 %v1646_v12 }
 0x26b   : > { %v1579_v5 = vpop.f32.mrf.mxu0 }
 0x26c   : > { %v1580_v10 = vadd.f32 %v3043_v38, %v1579_v5 }
 0x26e   : > { %v1626_v14 = vmax.f32 %v1580_v10, 0.0 }
 0x26f   : > { %v1737_v6 = vpop.f32.mrf.mxu1 }
 0x270   : > { %v2528_v15 = vpack.c.bf16 %v1737_v6, %v1735_v4 }
 0x272   : > { %2596 = vst [vmem:[%s3081_s24 + $0x10] sm:$0xff] %v2528_v15  }
 0x273   : > { %v1581_v11 = vpop.f32.mrf.mxu0 }
 0x274   : > { %v1582_v13 = vadd.f32 %v3043_v38, %v1581_v11 }
 0x276   : > { %v1627_v23 = vmax.f32 %v1582_v13, 0.0 }
 0x277   : > { %v1740_v16 = vpop.f32.mrf.mxu1 }
 0x278   : > { %v1647_v17 = vpack.c.bf16 %v1627_v23, %v1626_v14 }
 0x27a   : > { %1779 = vmatmul.bf16.gmra.mxu1 %v1647_v17 }
 0x27b   : > { %v1584_v19 = vpop.f32.mrf.mxu0 }
 0x27c   : > { %v1585_v18 = vadd.f32 %v3043_v38, %v1584_v19 }
 0x27e   : > { %v1628_v22 = vmax.f32 %v1585_v18, 0.0 }
 0x27f   : > { %v1742_v20 = vpop.f32.mrf.mxu1 }
 0x280   : > { %v2533_v7 = vpack.c.bf16 %v1742_v20, %v1740_v16 }
 0x282   : > { %2597 = vst [vmem:[%s3081_s24 + $0x18] sm:$0xff] %v2533_v7  }
 0x283   : > { %v1586_v9 = vpop.f32.mrf.mxu0 }
 0x284   : > { %v1587_v21 = vadd.f32 %v3043_v38, %v1586_v9 }
 0x286   : > { %v1629_v31 = vmax.f32 %v1587_v21, 0.0 }
 0x287   : > { %v1745_v32 = vpop.f32.mrf.mxu1 }
 0x288   : > { %v1648_v24 = vpack.c.bf16 %v1629_v31, %v1628_v22 }
 0x28a   : > { %1784 = vmatmul.bf16.gmra.mxu1 %v1648_v24 }
 0x28b   : > { %v1589_v25 = vpop.f32.mrf.mxu0 }
 0x28c   : > { %v1590_v42 = vadd.f32 %v3043_v38, %v1589_v25 }
 0x28e   : > { %v1630_v30 = vmax.f32 %v1590_v42, 0.0 }
 0x28f   : > { %v1747_v26 = vpop.f32.mrf.mxu1 }
 0x290   : > { %v2538_v27 = vpack.c.bf16 %v1747_v26, %v1745_v32 }
 0x292   : > { %2598 = vst [vmem:[%s3081_s24 + $0x20] sm:$0xff] %v2538_v27  }
 0x293   : > { %v1591_v28 = vpop.f32.mrf.mxu0 }
 0x294   : > { %v1592_v29 = vadd.f32 %v3043_v38, %v1591_v28 }
 0x296   : > { %v1631_v33 = vmax.f32 %v1592_v29, 0.0 }
 0x297   : > { %v1750_v34 = vpop.f32.mrf.mxu1 }
 0x298   : > { %v1649_v35 = vpack.c.bf16 %v1631_v33, %v1630_v30 }
 0x29a   : > { %1789 = vmatmul.bf16.gmra.mxu1 %v1649_v35 }
 0x29b   : > { %v1594_v36 = vpop.f32.mrf.mxu0 }
 0x29c   : > { %v1595_v48 = vadd.f32 %v3043_v38, %v1594_v36 }
 0x29e   : > { %v1632_v60 = vmax.f32 %v1595_v48, 0.0 }
 0x29f   : > { %v1752_v37 = vpop.f32.mrf.mxu1 }
 0x2a0   : > { %v2543_v39 = vpack.c.bf16 %v1752_v37, %v1750_v34 }
 0x2a2   : > { %2599 = vst [vmem:[%s3081_s24 + $0x28] sm:$0xff] %v2543_v39  }
 0x2a3   : > { %v1596_v40 = vpop.f32.mrf.mxu0 }
 0x2a4   : > { %v1597_v41 = vadd.f32 %v3043_v38, %v1596_v40 }
 0x2a6   : > { %v1633_v51 = vmax.f32 %v1597_v41, 0.0 }
 0x2a7   : > { %v1755_v43 = vpop.f32.mrf.mxu1 }
 0x2a8   : > { %v1650_v44 = vpack.c.bf16 %v1633_v51, %v1632_v60 }
 0x2aa   : > { %1794 = vmatmul.bf16.gmra.mxu1 %v1650_v44 }
 0x2ab   : > { %v1599_v45 = vpop.f32.mrf.mxu0 }
 0x2ac   : > { %v1600_v47 = vadd.f32 %v3043_v38, %v1599_v45 }
 0x2ae   : > { %v1634_v54 = vmax.f32 %v1600_v47, 0.0 }
 0x2af   : > { %v1757_v57 = vpop.f32.mrf.mxu1 }
 0x2b0   : > { %v2548_v46 = vpack.c.bf16 %v1757_v57, %v1755_v43 }
 0x2b2   : > { %2600 = vst [vmem:[%s3081_s24 + $0x30] sm:$0xff] %v2548_v46  }
 0x2b3   : > { %v1601_v52 = vpop.f32.mrf.mxu0 }
 0x2b4   : > { %v1602_v53 = vadd.f32 %v3043_v38, %v1601_v52 }
 0x2b6   : > { %v1635_v55 = vmax.f32 %v1602_v53, 0.0 }
 0x2b7   : > { %v1760_v56 = vpop.f32.mrf.mxu1 }
 0x2b8   : > { %v1651_v58 = vpack.c.bf16 %v1635_v55, %v1634_v54 }
 0x2ba   : > { %1799 = vmatmul.bf16.gmra.mxu1 %v1651_v58 }
 0x2bf   : > { %v1762_v49 = vpop.f32.mrf.mxu1 }
 0x2c0   : > { %v2553_v50 = vpack.c.bf16 %v1762_v49, %v1760_v56 }
 0x2c2   : > { %2601 = vst [vmem:[%s3081_s24 + $0x38] sm:$0xff] %v2553_v50  }
 0x2c7   : > { %v1765_v59 = vpop.f32.mrf.mxu1 }
 0x2cf   : > { %v1767_v8 = vpop.f32.mrf.mxu1 }
 0x2d0   : > { %v2558_v61 = vpack.c.bf16 %v1767_v8, %v1765_v59 }
 0x2d2   : > { %2602 = vst [vmem:[%s3081_s24 + $0x40] sm:$0xff] %v2558_v61  }
 0x2d7   : > { %v1770_v62 = vpop.f32.mrf.mxu1 }
 0x2df   : > { %v1772_v0 = vpop.f32.mrf.mxu1 }
 0x2e0   : > { %v2563_v1 = vpack.c.bf16 %v1772_v0, %v1770_v62 }
 0x2e2   : > { %2603 = vst [vmem:[%s3081_s24 + $0x48] sm:$0xff] %v2563_v1  }
 0x2e7   : > { %v1775_v38 = vpop.f32.mrf.mxu1 }
 0x2ef   : > { %v1777_v63 = vpop.f32.mrf.mxu1 }
 0x2f0   : > { %v2568_v2 = vpack.c.bf16 %v1777_v63, %v1775_v38 }
 0x2f2   : > { %2604 = vst [vmem:[%s3081_s24 + $0x50] sm:$0xff] %v2568_v2  }
 0x2f7   : > { %v1780_v3 = vpop.f32.mrf.mxu1 }
 0x2ff   : > { %v1782_v4 = vpop.f32.mrf.mxu1 }
 0x300   : > { %v2573_v12 = vpack.c.bf16 %v1782_v4, %v1780_v3 }
 0x302   : > { %2605 = vst [vmem:[%s3081_s24 + $0x58] sm:$0xff] %v2573_v12  }
 0x307   : > { %v1785_v5 = vpop.f32.mrf.mxu1 }
 0x30f   : > { %v1787_v6 = vpop.f32.mrf.mxu1 }
 0x310   : > { %v2578_v15 = vpack.c.bf16 %v1787_v6, %v1785_v5 }
 0x312   : > { %2606 = vst [vmem:[%s3081_s24 + $0x60] sm:$0xff] %v2578_v15  }
 0x317   : > { %v1790_v10 = vpop.f32.mrf.mxu1 }
 0x31f   : > { %v1792_v11 = vpop.f32.mrf.mxu1 }
 0x320   : > { %v2583_v13 = vpack.c.bf16 %v1792_v11, %v1790_v10 }
 0x322   : > { %2607 = vst [vmem:[%s3081_s24 + $0x68] sm:$0xff] %v2583_v13  }
 0x327   : > { %v1795_v14 = vpop.f32.mrf.mxu1 }
 0x32f   : > { %v1797_v23 = vpop.f32.mrf.mxu1 }
 0x330   : > { %v2588_v16 = vpack.c.bf16 %v1797_v23, %v1795_v14 }
 0x332   : > { %2608 = vst [vmem:[%s3081_s24 + $0x70] sm:$0xff] %v2588_v16  }
 0x337   : > { %v1800_v17 = vpop.f32.mrf.mxu1 }
 0x33f   : > { %v1802_v19 = vpop.f32.mrf.mxu1 }
 0x340   : > { %v2593_v20 = vpack.c.bf16 %v1802_v19, %v1800_v17 }
 0x342   : > { %2609 = vst [vmem:[%s3081_s24 + $0x78] sm:$0xff] %v2593_v20  }
 0x343 PF: > { %s15_s20 = sadd.s32 1, %s2673_s20   ;;  %s3128_s18 = smov %s2669_s19 }
 0x344   : > { %p12_p5 = scmp.ge.s32.totalorder %s15_s20, 4   ;;  %s3129_s19 = smov %s3131_s21 }
 0x346   :  { %14 = sbr.rel (!%p12_p5) target bundleno = 2 (0x2), region = 83 }

</bundles_post_ra>
